<compile_context>
chip_gen: v6e
topology: v6e:2x2x1
jax: 0.10.0
libtpu: 0.0.40
codegen_flags: <defaults>
</compile_context>

<pallas_src>
import jax
import jax.numpy as jnp
from jax.experimental import pallas as pl
from jax.experimental.pallas import tpu as pltpu

# model hyperparams (small, consistent with the module's forward)
B = 2          # batch
T = 8          # rnn_sequence_length
I = 32         # rnn_input_size
H = 32         # rnn_h_size
N_LAYERS = 2   # rnn_n_layers


# --------------------------------- kernel ------------------------------------
def gru_value_kernel(x_ref,
                     wih0_ref, whh0_ref, bi0_ref, bhn0_ref,
                     wih1_ref, whh1_ref, bi1_ref, bhn1_ref,
                     wh_ref, bh_ref,
                     out_ref):
    """Single invocation: whole sequence, both GRU layers, fused value heads."""
    bsz, t_len, _ = x_ref.shape
    h = whh0_ref.shape[0]        # hidden size (Whh is (H, 3H))

    # Hoist every operand load above the unrolled time loop (into vregs).
    x_all = x_ref[...]           # (B, T, I)
    wih0 = wih0_ref[...]         # (I, 3H)
    whh0 = whh0_ref[...]         # (H, 3H)
    bi0 = bi0_ref[...]           # (1, 3H)  r/z parts already contain b_ih + b_hh
    bhn0 = bhn0_ref[...]         # (1, 3H)  zeros except n cols = b_hn
    wih1 = wih1_ref[...]         # (H, 3H)
    whh1 = whh1_ref[...]         # (H, 3H)
    bi1 = bi1_ref[...]           # (1, 3H)
    bhn1 = bhn1_ref[...]         # (1, 3H)
    wh = wh_ref[...]             # (H, 2)   [value_ext | value_int]
    bh = bh_ref[...]             # (1, 2)

    def cell(gi, h_prev, whh, bhn):
        # gi = W_i x + b_i   (r/z cols also carry the summed recurrent bias)
        # gh = W_h h + [0, 0, b_hn]
        gh = jnp.dot(h_prev, whh, preferred_element_type=jnp.float32) + bhn
        rz = jax.nn.sigmoid(gi[:, :2 * h] + gh[:, :2 * h])   # one EUP call for r & z
        r = rz[:, 0:h]
        z = rz[:, h:2 * h]
        n = jnp.tanh(gi[:, 2 * h:] + r * gh[:, 2 * h:])
        return (1.0 - z) * n + z * h_prev

    h0 = jnp.zeros((bsz, h), jnp.float32)    # torch module uses h0 = zeros
    h1 = jnp.zeros((bsz, h), jnp.float32)

    # Layer-0 input projections depend only on x -> off the recurrence critical
    # path; computed up-front so the scheduler can overlap them freely.
    gi0 = [jnp.dot(x_all[:, t, :], wih0, preferred_element_type=jnp.float32) + bi0
           for t in range(t_len)]

    # Fully unrolled static time loop (T small) -> static slices, value-carried h.
    for t in range(t_len):
        h0 = cell(gi0[t], h0, whh0, bhn0)                                  # layer 0
        gi1 = jnp.dot(h0, wih1, preferred_element_type=jnp.float32) + bi1  # layer-1 input proj
        h1 = cell(gi1, h1, whh1, bhn1)                                     # layer 1

    # Fused value heads: out = [v_ext | v_int], shape (B, 2).
    out_ref[...] = jnp.dot(h1, wh, preferred_element_type=jnp.float32) + bh


# ----------------------- one-time param fusion (host side) --------------------
def prepare_params(params):
    """Fuse PyTorch-layout GRU / Linear params into the kernel layout (done once)."""
    h = params["w_hh_l0"].shape[1]

    def fuse_layer(wih, whh, bih, bhh):
        # PyTorch layouts: wih (3H, in), whh (3H, H), biases (3H,), gate order r,z,n.
        wih_t = jnp.asarray(wih.T, jnp.float32)                 # (in, 3H)
        whh_t = jnp.asarray(whh.T, jnp.float32)                 # (H, 3H)
        bi = jnp.concatenate([bih[:2 * h] + bhh[:2 * h],        # r,z: pre-summed bias
                              bih[2 * h:]])[None, :]            # n:   b_in only
        bhn = jnp.concatenate([jnp.zeros((2 * h,), jnp.float32),
                               bhh[2 * h:]])[None, :]           # n:   b_hn only
        return wih_t, whh_t, bi.astype(jnp.float32), bhn.astype(jnp.float32)

    wih0, whh0, bi0, bhn0 = fuse_layer(params["w_ih_l0"], params["w_hh_l0"],
                                       params["b_ih_l0"], params["b_hh_l0"])
    wih1, whh1, bi1, bhn1 = fuse_layer(params["w_ih_l1"], params["w_hh_l1"],
                                       params["b_ih_l1"], params["b_hh_l1"])
    wh = jnp.concatenate([params["w_ext"].T, params["w_int"].T], axis=1)   # (H, 2)
    bh = jnp.concatenate([params["b_ext"], params["b_int"]])[None, :]      # (1, 2)
    return {"wih0": wih0, "whh0": whh0, "bi0": bi0, "bhn0": bhn0,
            "wih1": wih1, "whh1": whh1, "bi1": bi1, "bhn1": bhn1,
            "wh": wh, "bh": bh}


# -------------------------------- wrapper -------------------------------------
@jax.jit
def mcts_value_net(zs, fused):
    """zs: (B, T, I) float32 (batch_first).  Returns (v_ext, v_int), each (B, 1)."""
    vmem = pl.BlockSpec(memory_space=pltpu.MemorySpace.VMEM)   # whole array in VMEM
    out = pl.pallas_call(
        gru_value_kernel,
        out_shape=jax.ShapeDtypeStruct((zs.shape[0], 2), jnp.float32),
        in_specs=[vmem] * 11,
        out_specs=vmem,
    )(zs,
      fused["wih0"], fused["whh0"], fused["bi0"], fused["bhn0"],
      fused["wih1"], fused["whh1"], fused["bi1"], fused["bhn1"],
      fused["wh"], fused["bh"])
    return out[:, 0:1], out[:, 1:2]


# --------------------------- pure-JAX reference --------------------------------
def mcts_value_net_ref(zs, params):
    bsz = zs.shape[0]
    h = [jnp.zeros((bsz, H), jnp.float32) for _ in range(N_LAYERS)]
    layer_p = [(params["w_ih_l0"], params["w_hh_l0"], params["b_ih_l0"], params["b_hh_l0"]),
               (params["w_ih_l1"], params["w_hh_l1"], params["b_ih_l1"], params["b_hh_l1"])]
    for t in range(zs.shape[1]):
        x = zs[:, t, :]
        for l, (wih, whh, bih, bhh) in enumerate(layer_p):
            gi = x @ wih.T + bih
            gh = h[l] @ whh.T + bhh
            r = jax.nn.sigmoid(gi[:, :H] + gh[:, :H])
            z = jax.nn.sigmoid(gi[:, H:2 * H] + gh[:, H:2 * H])
            n = jnp.tanh(gi[:, 2 * H:] + r * gh[:, 2 * H:])
            h[l] = (1.0 - z) * n + z * h[l]
            x = h[l]
    hl = h[-1]
    return (hl @ params["w_ext"].T + params["b_ext"],
            hl @ params["w_int"].T + params["b_int"])


# --------------------------------- main ----------------------------------------
def init_params(key):
    """Deterministic init, PyTorch-style U(-1/sqrt(H), 1/sqrt(H)), PyTorch layouts."""
    bound = 1.0 / jnp.sqrt(H)
    ks = jax.random.split(key, 12)
    u = lambda k, shape: jax.random.uniform(k, shape, jnp.float32, -bound, bound)
    return {
        "w_ih_l0": u(ks[0], (3 * H, I)), "w_hh_l0": u(ks[1], (3 * H, H)),
        "b_ih_l0": u(ks[2], (3 * H,)),   "b_hh_l0": u(ks[3], (3 * H,)),
        "w_ih_l1": u(ks[4], (3 * H, H)), "w_hh_l1": u(ks[5], (3 * H, H)),
        "b_ih_l1": u(ks[6], (3 * H,)),   "b_hh_l1": u(ks[7], (3 * H,)),
        "w_ext": u(ks[8], (1, H)),  "b_ext": u(ks[9], (1,)),
        "w_int": u(ks[10], (1, H)), "b_int": u(ks[11], (1,)),
    }


if __name__ == "__main__":
    key = jax.random.PRNGKey(0)
    k_x, k_p = jax.random.split(key)
    zs = jax.random.normal(k_x, (B, T, I), jnp.float32)
    params = init_params(k_p)
    fused = prepare_params(params)   # one-time host-side weight fusion

    v_ext, v_int = mcts_value_net(zs, fused)
    jax.block_until_ready((v_ext, v_int))

    v_ext_ref, v_int_ref = mcts_value_net_ref(zs, params)
    assert v_ext.shape == (B, 1) and v_int.shape == (B, 1)
    assert jnp.allclose(v_ext, v_ext_ref, atol=1e-4, rtol=1e-4)
    assert jnp.allclose(v_int, v_int_ref, atol=1e-4, rtol=1e-4)

    print("KERNEL_OK")
</pallas_src>

<mosaic_0001>
module attributes {stable_mosaic.version = 11 : i64} {
  func.func @gru_value_kernel(%arg0: memref<2x8x32xf32, #tpu.memory_space<vmem>>, %arg1: memref<32x96xf32, #tpu.memory_space<vmem>>, %arg2: memref<32x96xf32, #tpu.memory_space<vmem>>, %arg3: memref<1x96xf32, #tpu.memory_space<vmem>>, %arg4: memref<1x96xf32, #tpu.memory_space<vmem>>, %arg5: memref<32x96xf32, #tpu.memory_space<vmem>>, %arg6: memref<32x96xf32, #tpu.memory_space<vmem>>, %arg7: memref<1x96xf32, #tpu.memory_space<vmem>>, %arg8: memref<1x96xf32, #tpu.memory_space<vmem>>, %arg9: memref<32x2xf32, #tpu.memory_space<vmem>>, %arg10: memref<1x2xf32, #tpu.memory_space<vmem>>, %arg11: memref<2x2xf32, #tpu.memory_space<vmem>>) attributes {dimension_semantics = [], scalar_prefetch = 0 : i64, scratch_operands = 0 : i64, tpu.core_type = #tpu.core_type<tc>} {
    %c0 = arith.constant 0 : index
    %c0_0 = arith.constant 0 : index
    %c0_1 = arith.constant 0 : index
    %0 = vector.load %arg0[%c0, %c0_0, %c0_1] : memref<2x8x32xf32, #tpu.memory_space<vmem>>, vector<2x8x32xf32>
    %c0_2 = arith.constant 0 : index
    %c0_3 = arith.constant 0 : index
    %1 = vector.load %arg1[%c0_2, %c0_3] : memref<32x96xf32, #tpu.memory_space<vmem>>, vector<32x96xf32>
    %c0_4 = arith.constant 0 : index
    %c0_5 = arith.constant 0 : index
    %2 = vector.load %arg2[%c0_4, %c0_5] : memref<32x96xf32, #tpu.memory_space<vmem>>, vector<32x96xf32>
    %c0_6 = arith.constant 0 : index
    %c0_7 = arith.constant 0 : index
    %3 = vector.load %arg3[%c0_6, %c0_7] : memref<1x96xf32, #tpu.memory_space<vmem>>, vector<1x96xf32>
    %c0_8 = arith.constant 0 : index
    %c0_9 = arith.constant 0 : index
    %4 = vector.load %arg4[%c0_8, %c0_9] : memref<1x96xf32, #tpu.memory_space<vmem>>, vector<1x96xf32>
    %c0_10 = arith.constant 0 : index
    %c0_11 = arith.constant 0 : index
    %5 = vector.load %arg5[%c0_10, %c0_11] : memref<32x96xf32, #tpu.memory_space<vmem>>, vector<32x96xf32>
    %c0_12 = arith.constant 0 : index
    %c0_13 = arith.constant 0 : index
    %6 = vector.load %arg6[%c0_12, %c0_13] : memref<32x96xf32, #tpu.memory_space<vmem>>, vector<32x96xf32>
    %c0_14 = arith.constant 0 : index
    %c0_15 = arith.constant 0 : index
    %7 = vector.load %arg7[%c0_14, %c0_15] : memref<1x96xf32, #tpu.memory_space<vmem>>, vector<1x96xf32>
    %c0_16 = arith.constant 0 : index
    %c0_17 = arith.constant 0 : index
    %8 = vector.load %arg8[%c0_16, %c0_17] : memref<1x96xf32, #tpu.memory_space<vmem>>, vector<1x96xf32>
    %c0_18 = arith.constant 0 : index
    %c0_19 = arith.constant 0 : index
    %9 = vector.load %arg9[%c0_18, %c0_19] : memref<32x2xf32, #tpu.memory_space<vmem>>, vector<32x2xf32>
    %c0_20 = arith.constant 0 : index
    %c0_21 = arith.constant 0 : index
    %10 = vector.load %arg10[%c0_20, %c0_21] : memref<1x2xf32, #tpu.memory_space<vmem>>, vector<1x2xf32>
    %cst = arith.constant 0.000000e+00 : f32
    %11 = vector.broadcast %cst : f32 to vector<2x32xf32>
    %cst_22 = arith.constant 0.000000e+00 : f32
    %12 = vector.broadcast %cst_22 : f32 to vector<2x32xf32>
    %13 = vector.extract_strided_slice %0 {offsets = [0, 0, 0], sizes = [2, 1, 32], strides = [1, 1, 1]} : vector<2x8x32xf32> to vector<2x1x32xf32>
    %14 = vector.shape_cast %13 : vector<2x1x32xf32> to vector<2x32xf32>
    %cst_23 = arith.constant dense<0.000000e+00> : vector<2x96xf32>
    %15 = tpu.matmul %14, %1, %cst_23 {dimension_numbers = #tpu.dot_dimension_numbers<[1], [0], [0], [1], [0, 0, 1, 1], [], []>} : vector<2x32xf32>, vector<32x96xf32>, vector<2x96xf32> -> vector<2x96xf32>
    %16 = vector.broadcast %3 : vector<1x96xf32> to vector<2x96xf32>
    %17 = arith.addf %15, %16 : vector<2x96xf32>
    %18 = vector.extract_strided_slice %0 {offsets = [0, 1, 0], sizes = [2, 1, 32], strides = [1, 1, 1]} : vector<2x8x32xf32> to vector<2x1x32xf32>
    %19 = vector.shape_cast %18 : vector<2x1x32xf32> to vector<2x32xf32>
    %cst_24 = arith.constant dense<0.000000e+00> : vector<2x96xf32>
    %20 = tpu.matmul %19, %1, %cst_24 {dimension_numbers = #tpu.dot_dimension_numbers<[1], [0], [0], [1], [0, 0, 1, 1], [], []>} : vector<2x32xf32>, vector<32x96xf32>, vector<2x96xf32> -> vector<2x96xf32>
    %21 = vector.broadcast %3 : vector<1x96xf32> to vector<2x96xf32>
    %22 = arith.addf %20, %21 : vector<2x96xf32>
    %23 = vector.extract_strided_slice %0 {offsets = [0, 2, 0], sizes = [2, 1, 32], strides = [1, 1, 1]} : vector<2x8x32xf32> to vector<2x1x32xf32>
    %24 = vector.shape_cast %23 : vector<2x1x32xf32> to vector<2x32xf32>
    %cst_25 = arith.constant dense<0.000000e+00> : vector<2x96xf32>
    %25 = tpu.matmul %24, %1, %cst_25 {dimension_numbers = #tpu.dot_dimension_numbers<[1], [0], [0], [1], [0, 0, 1, 1], [], []>} : vector<2x32xf32>, vector<32x96xf32>, vector<2x96xf32> -> vector<2x96xf32>
    %26 = vector.broadcast %3 : vector<1x96xf32> to vector<2x96xf32>
    %27 = arith.addf %25, %26 : vector<2x96xf32>
    %28 = vector.extract_strided_slice %0 {offsets = [0, 3, 0], sizes = [2, 1, 32], strides = [1, 1, 1]} : vector<2x8x32xf32> to vector<2x1x32xf32>
    %29 = vector.shape_cast %28 : vector<2x1x32xf32> to vector<2x32xf32>
    %cst_26 = arith.constant dense<0.000000e+00> : vector<2x96xf32>
    %30 = tpu.matmul %29, %1, %cst_26 {dimension_numbers = #tpu.dot_dimension_numbers<[1], [0], [0], [1], [0, 0, 1, 1], [], []>} : vector<2x32xf32>, vector<32x96xf32>, vector<2x96xf32> -> vector<2x96xf32>
    %31 = vector.broadcast %3 : vector<1x96xf32> to vector<2x96xf32>
    %32 = arith.addf %30, %31 : vector<2x96xf32>
    %33 = vector.extract_strided_slice %0 {offsets = [0, 4, 0], sizes = [2, 1, 32], strides = [1, 1, 1]} : vector<2x8x32xf32> to vector<2x1x32xf32>
    %34 = vector.shape_cast %33 : vector<2x1x32xf32> to vector<2x32xf32>
    %cst_27 = arith.constant dense<0.000000e+00> : vector<2x96xf32>
    %35 = tpu.matmul %34, %1, %cst_27 {dimension_numbers = #tpu.dot_dimension_numbers<[1], [0], [0], [1], [0, 0, 1, 1], [], []>} : vector<2x32xf32>, vector<32x96xf32>, vector<2x96xf32> -> vector<2x96xf32>
    %36 = vector.broadcast %3 : vector<1x96xf32> to vector<2x96xf32>
    %37 = arith.addf %35, %36 : vector<2x96xf32>
    %38 = vector.extract_strided_slice %0 {offsets = [0, 5, 0], sizes = [2, 1, 32], strides = [1, 1, 1]} : vector<2x8x32xf32> to vector<2x1x32xf32>
    %39 = vector.shape_cast %38 : vector<2x1x32xf32> to vector<2x32xf32>
    %cst_28 = arith.constant dense<0.000000e+00> : vector<2x96xf32>
    %40 = tpu.matmul %39, %1, %cst_28 {dimension_numbers = #tpu.dot_dimension_numbers<[1], [0], [0], [1], [0, 0, 1, 1], [], []>} : vector<2x32xf32>, vector<32x96xf32>, vector<2x96xf32> -> vector<2x96xf32>
    %41 = vector.broadcast %3 : vector<1x96xf32> to vector<2x96xf32>
    %42 = arith.addf %40, %41 : vector<2x96xf32>
    %43 = vector.extract_strided_slice %0 {offsets = [0, 6, 0], sizes = [2, 1, 32], strides = [1, 1, 1]} : vector<2x8x32xf32> to vector<2x1x32xf32>
    %44 = vector.shape_cast %43 : vector<2x1x32xf32> to vector<2x32xf32>
    %cst_29 = arith.constant dense<0.000000e+00> : vector<2x96xf32>
    %45 = tpu.matmul %44, %1, %cst_29 {dimension_numbers = #tpu.dot_dimension_numbers<[1], [0], [0], [1], [0, 0, 1, 1], [], []>} : vector<2x32xf32>, vector<32x96xf32>, vector<2x96xf32> -> vector<2x96xf32>
    %46 = vector.broadcast %3 : vector<1x96xf32> to vector<2x96xf32>
    %47 = arith.addf %45, %46 : vector<2x96xf32>
    %48 = vector.extract_strided_slice %0 {offsets = [0, 7, 0], sizes = [2, 1, 32], strides = [1, 1, 1]} : vector<2x8x32xf32> to vector<2x1x32xf32>
    %49 = vector.shape_cast %48 : vector<2x1x32xf32> to vector<2x32xf32>
    %cst_30 = arith.constant dense<0.000000e+00> : vector<2x96xf32>
    %50 = tpu.matmul %49, %1, %cst_30 {dimension_numbers = #tpu.dot_dimension_numbers<[1], [0], [0], [1], [0, 0, 1, 1], [], []>} : vector<2x32xf32>, vector<32x96xf32>, vector<2x96xf32> -> vector<2x96xf32>
    %51 = vector.broadcast %3 : vector<1x96xf32> to vector<2x96xf32>
    %52 = arith.addf %50, %51 : vector<2x96xf32>
    %cst_31 = arith.constant dense<0.000000e+00> : vector<2x96xf32>
    %53 = tpu.matmul %11, %2, %cst_31 {dimension_numbers = #tpu.dot_dimension_numbers<[1], [0], [0], [1], [0, 0, 1, 1], [], []>} : vector<2x32xf32>, vector<32x96xf32>, vector<2x96xf32> -> vector<2x96xf32>
    %54 = vector.broadcast %4 : vector<1x96xf32> to vector<2x96xf32>
    %55 = arith.addf %53, %54 : vector<2x96xf32>
    %56 = vector.extract_strided_slice %17 {offsets = [0, 0], sizes = [2, 64], strides = [1, 1]} : vector<2x96xf32> to vector<2x64xf32>
    %57 = vector.extract_strided_slice %55 {offsets = [0, 0], sizes = [2, 64], strides = [1, 1]} : vector<2x96xf32> to vector<2x64xf32>
    %58 = arith.addf %56, %57 : vector<2x64xf32>
    %59 = arith.negf %58 : vector<2x64xf32>
    %60 = math.exp %59 : vector<2x64xf32>
    %cst_32 = arith.constant 1.000000e+00 : f32
    %61 = vector.broadcast %cst_32 : f32 to vector<2x64xf32>
    %62 = arith.addf %61, %60 : vector<2x64xf32>
    %63 = arith.divf %61, %62 : vector<2x64xf32>
    %64 = vector.extract_strided_slice %63 {offsets = [0, 0], sizes = [2, 32], strides = [1, 1]} : vector<2x64xf32> to vector<2x32xf32>
    %65 = vector.extract_strided_slice %63 {offsets = [0, 32], sizes = [2, 32], strides = [1, 1]} : vector<2x64xf32> to vector<2x32xf32>
    %66 = vector.extract_strided_slice %17 {offsets = [0, 64], sizes = [2, 32], strides = [1, 1]} : vector<2x96xf32> to vector<2x32xf32>
    %67 = vector.extract_strided_slice %55 {offsets = [0, 64], sizes = [2, 32], strides = [1, 1]} : vector<2x96xf32> to vector<2x32xf32>
    %68 = arith.mulf %64, %67 : vector<2x32xf32>
    %69 = arith.addf %66, %68 : vector<2x32xf32>
    %70 = math.tanh %69 : vector<2x32xf32>
    %cst_33 = arith.constant 1.000000e+00 : f32
    %71 = vector.broadcast %cst_33 : f32 to vector<2x32xf32>
    %72 = arith.subf %71, %65 : vector<2x32xf32>
    %73 = arith.mulf %72, %70 : vector<2x32xf32>
    %74 = arith.mulf %65, %11 : vector<2x32xf32>
    %75 = arith.addf %73, %74 : vector<2x32xf32>
    %cst_34 = arith.constant dense<0.000000e+00> : vector<2x96xf32>
    %76 = tpu.matmul %75, %5, %cst_34 {dimension_numbers = #tpu.dot_dimension_numbers<[1], [0], [0], [1], [0, 0, 1, 1], [], []>} : vector<2x32xf32>, vector<32x96xf32>, vector<2x96xf32> -> vector<2x96xf32>
    %77 = vector.broadcast %7 : vector<1x96xf32> to vector<2x96xf32>
    %78 = arith.addf %76, %77 : vector<2x96xf32>
    %cst_35 = arith.constant dense<0.000000e+00> : vector<2x96xf32>
    %79 = tpu.matmul %12, %6, %cst_35 {dimension_numbers = #tpu.dot_dimension_numbers<[1], [0], [0], [1], [0, 0, 1, 1], [], []>} : vector<2x32xf32>, vector<32x96xf32>, vector<2x96xf32> -> vector<2x96xf32>
    %80 = vector.broadcast %8 : vector<1x96xf32> to vector<2x96xf32>
    %81 = arith.addf %79, %80 : vector<2x96xf32>
    %82 = vector.extract_strided_slice %78 {offsets = [0, 0], sizes = [2, 64], strides = [1, 1]} : vector<2x96xf32> to vector<2x64xf32>
    %83 = vector.extract_strided_slice %81 {offsets = [0, 0], sizes = [2, 64], strides = [1, 1]} : vector<2x96xf32> to vector<2x64xf32>
    %84 = arith.addf %82, %83 : vector<2x64xf32>
    %85 = arith.negf %84 : vector<2x64xf32>
    %86 = math.exp %85 : vector<2x64xf32>
    %cst_36 = arith.constant 1.000000e+00 : f32
    %87 = vector.broadcast %cst_36 : f32 to vector<2x64xf32>
    %88 = arith.addf %87, %86 : vector<2x64xf32>
    %89 = arith.divf %87, %88 : vector<2x64xf32>
    %90 = vector.extract_strided_slice %89 {offsets = [0, 0], sizes = [2, 32], strides = [1, 1]} : vector<2x64xf32> to vector<2x32xf32>
    %91 = vector.extract_strided_slice %89 {offsets = [0, 32], sizes = [2, 32], strides = [1, 1]} : vector<2x64xf32> to vector<2x32xf32>
    %92 = vector.extract_strided_slice %78 {offsets = [0, 64], sizes = [2, 32], strides = [1, 1]} : vector<2x96xf32> to vector<2x32xf32>
    %93 = vector.extract_strided_slice %81 {offsets = [0, 64], sizes = [2, 32], strides = [1, 1]} : vector<2x96xf32> to vector<2x32xf32>
    %94 = arith.mulf %90, %93 : vector<2x32xf32>
    %95 = arith.addf %92, %94 : vector<2x32xf32>
    %96 = math.tanh %95 : vector<2x32xf32>
    %cst_37 = arith.constant 1.000000e+00 : f32
    %97 = vector.broadcast %cst_37 : f32 to vector<2x32xf32>
    %98 = arith.subf %97, %91 : vector<2x32xf32>
    %99 = arith.mulf %98, %96 : vector<2x32xf32>
    %100 = arith.mulf %91, %12 : vector<2x32xf32>
    %101 = arith.addf %99, %100 : vector<2x32xf32>
    %cst_38 = arith.constant dense<0.000000e+00> : vector<2x96xf32>
    %102 = tpu.matmul %75, %2, %cst_38 {dimension_numbers = #tpu.dot_dimension_numbers<[1], [0], [0], [1], [0, 0, 1, 1], [], []>} : vector<2x32xf32>, vector<32x96xf32>, vector<2x96xf32> -> vector<2x96xf32>
    %103 = vector.broadcast %4 : vector<1x96xf32> to vector<2x96xf32>
    %104 = arith.addf %102, %103 : vector<2x96xf32>
    %105 = vector.extract_strided_slice %22 {offsets = [0, 0], sizes = [2, 64], strides = [1, 1]} : vector<2x96xf32> to vector<2x64xf32>
    %106 = vector.extract_strided_slice %104 {offsets = [0, 0], sizes = [2, 64], strides = [1, 1]} : vector<2x96xf32> to vector<2x64xf32>
    %107 = arith.addf %105, %106 : vector<2x64xf32>
    %108 = arith.negf %107 : vector<2x64xf32>
    %109 = math.exp %108 : vector<2x64xf32>
    %cst_39 = arith.constant 1.000000e+00 : f32
    %110 = vector.broadcast %cst_39 : f32 to vector<2x64xf32>
    %111 = arith.addf %110, %109 : vector<2x64xf32>
    %112 = arith.divf %110, %111 : vector<2x64xf32>
    %113 = vector.extract_strided_slice %112 {offsets = [0, 0], sizes = [2, 32], strides = [1, 1]} : vector<2x64xf32> to vector<2x32xf32>
    %114 = vector.extract_strided_slice %112 {offsets = [0, 32], sizes = [2, 32], strides = [1, 1]} : vector<2x64xf32> to vector<2x32xf32>
    %115 = vector.extract_strided_slice %22 {offsets = [0, 64], sizes = [2, 32], strides = [1, 1]} : vector<2x96xf32> to vector<2x32xf32>
    %116 = vector.extract_strided_slice %104 {offsets = [0, 64], sizes = [2, 32], strides = [1, 1]} : vector<2x96xf32> to vector<2x32xf32>
    %117 = arith.mulf %113, %116 : vector<2x32xf32>
    %118 = arith.addf %115, %117 : vector<2x32xf32>
    %119 = math.tanh %118 : vector<2x32xf32>
    %cst_40 = arith.constant 1.000000e+00 : f32
    %120 = vector.broadcast %cst_40 : f32 to vector<2x32xf32>
    %121 = arith.subf %120, %114 : vector<2x32xf32>
    %122 = arith.mulf %121, %119 : vector<2x32xf32>
    %123 = arith.mulf %114, %75 : vector<2x32xf32>
    %124 = arith.addf %122, %123 : vector<2x32xf32>
    %cst_41 = arith.constant dense<0.000000e+00> : vector<2x96xf32>
    %125 = tpu.matmul %124, %5, %cst_41 {dimension_numbers = #tpu.dot_dimension_numbers<[1], [0], [0], [1], [0, 0, 1, 1], [], []>} : vector<2x32xf32>, vector<32x96xf32>, vector<2x96xf32> -> vector<2x96xf32>
    %126 = vector.broadcast %7 : vector<1x96xf32> to vector<2x96xf32>
    %127 = arith.addf %125, %126 : vector<2x96xf32>
    %cst_42 = arith.constant dense<0.000000e+00> : vector<2x96xf32>
    %128 = tpu.matmul %101, %6, %cst_42 {dimension_numbers = #tpu.dot_dimension_numbers<[1], [0], [0], [1], [0, 0, 1, 1], [], []>} : vector<2x32xf32>, vector<32x96xf32>, vector<2x96xf32> -> vector<2x96xf32>
    %129 = vector.broadcast %8 : vector<1x96xf32> to vector<2x96xf32>
    %130 = arith.addf %128, %129 : vector<2x96xf32>
    %131 = vector.extract_strided_slice %127 {offsets = [0, 0], sizes = [2, 64], strides = [1, 1]} : vector<2x96xf32> to vector<2x64xf32>
    %132 = vector.extract_strided_slice %130 {offsets = [0, 0], sizes = [2, 64], strides = [1, 1]} : vector<2x96xf32> to vector<2x64xf32>
    %133 = arith.addf %131, %132 : vector<2x64xf32>
    %134 = arith.negf %133 : vector<2x64xf32>
    %135 = math.exp %134 : vector<2x64xf32>
    %cst_43 = arith.constant 1.000000e+00 : f32
    %136 = vector.broadcast %cst_43 : f32 to vector<2x64xf32>
    %137 = arith.addf %136, %135 : vector<2x64xf32>
    %138 = arith.divf %136, %137 : vector<2x64xf32>
    %139 = vector.extract_strided_slice %138 {offsets = [0, 0], sizes = [2, 32], strides = [1, 1]} : vector<2x64xf32> to vector<2x32xf32>
    %140 = vector.extract_strided_slice %138 {offsets = [0, 32], sizes = [2, 32], strides = [1, 1]} : vector<2x64xf32> to vector<2x32xf32>
    %141 = vector.extract_strided_slice %127 {offsets = [0, 64], sizes = [2, 32], strides = [1, 1]} : vector<2x96xf32> to vector<2x32xf32>
    %142 = vector.extract_strided_slice %130 {offsets = [0, 64], sizes = [2, 32], strides = [1, 1]} : vector<2x96xf32> to vector<2x32xf32>
    %143 = arith.mulf %139, %142 : vector<2x32xf32>
    %144 = arith.addf %141, %143 : vector<2x32xf32>
    %145 = math.tanh %144 : vector<2x32xf32>
    %cst_44 = arith.constant 1.000000e+00 : f32
    %146 = vector.broadcast %cst_44 : f32 to vector<2x32xf32>
    %147 = arith.subf %146, %140 : vector<2x32xf32>
    %148 = arith.mulf %147, %145 : vector<2x32xf32>
    %149 = arith.mulf %140, %101 : vector<2x32xf32>
    %150 = arith.addf %148, %149 : vector<2x32xf32>
    %cst_45 = arith.constant dense<0.000000e+00> : vector<2x96xf32>
    %151 = tpu.matmul %124, %2, %cst_45 {dimension_numbers = #tpu.dot_dimension_numbers<[1], [0], [0], [1], [0, 0, 1, 1], [], []>} : vector<2x32xf32>, vector<32x96xf32>, vector<2x96xf32> -> vector<2x96xf32>
    %152 = vector.broadcast %4 : vector<1x96xf32> to vector<2x96xf32>
    %153 = arith.addf %151, %152 : vector<2x96xf32>
    %154 = vector.extract_strided_slice %27 {offsets = [0, 0], sizes = [2, 64], strides = [1, 1]} : vector<2x96xf32> to vector<2x64xf32>
    %155 = vector.extract_strided_slice %153 {offsets = [0, 0], sizes = [2, 64], strides = [1, 1]} : vector<2x96xf32> to vector<2x64xf32>
    %156 = arith.addf %154, %155 : vector<2x64xf32>
    %157 = arith.negf %156 : vector<2x64xf32>
    %158 = math.exp %157 : vector<2x64xf32>
    %cst_46 = arith.constant 1.000000e+00 : f32
    %159 = vector.broadcast %cst_46 : f32 to vector<2x64xf32>
    %160 = arith.addf %159, %158 : vector<2x64xf32>
    %161 = arith.divf %159, %160 : vector<2x64xf32>
    %162 = vector.extract_strided_slice %161 {offsets = [0, 0], sizes = [2, 32], strides = [1, 1]} : vector<2x64xf32> to vector<2x32xf32>
    %163 = vector.extract_strided_slice %161 {offsets = [0, 32], sizes = [2, 32], strides = [1, 1]} : vector<2x64xf32> to vector<2x32xf32>
    %164 = vector.extract_strided_slice %27 {offsets = [0, 64], sizes = [2, 32], strides = [1, 1]} : vector<2x96xf32> to vector<2x32xf32>
    %165 = vector.extract_strided_slice %153 {offsets = [0, 64], sizes = [2, 32], strides = [1, 1]} : vector<2x96xf32> to vector<2x32xf32>
    %166 = arith.mulf %162, %165 : vector<2x32xf32>
    %167 = arith.addf %164, %166 : vector<2x32xf32>
    %168 = math.tanh %167 : vector<2x32xf32>
    %cst_47 = arith.constant 1.000000e+00 : f32
    %169 = vector.broadcast %cst_47 : f32 to vector<2x32xf32>
    %170 = arith.subf %169, %163 : vector<2x32xf32>
    %171 = arith.mulf %170, %168 : vector<2x32xf32>
    %172 = arith.mulf %163, %124 : vector<2x32xf32>
    %173 = arith.addf %171, %172 : vector<2x32xf32>
    %cst_48 = arith.constant dense<0.000000e+00> : vector<2x96xf32>
    %174 = tpu.matmul %173, %5, %cst_48 {dimension_numbers = #tpu.dot_dimension_numbers<[1], [0], [0], [1], [0, 0, 1, 1], [], []>} : vector<2x32xf32>, vector<32x96xf32>, vector<2x96xf32> -> vector<2x96xf32>
    %175 = vector.broadcast %7 : vector<1x96xf32> to vector<2x96xf32>
    %176 = arith.addf %174, %175 : vector<2x96xf32>
    %cst_49 = arith.constant dense<0.000000e+00> : vector<2x96xf32>
    %177 = tpu.matmul %150, %6, %cst_49 {dimension_numbers = #tpu.dot_dimension_numbers<[1], [0], [0], [1], [0, 0, 1, 1], [], []>} : vector<2x32xf32>, vector<32x96xf32>, vector<2x96xf32> -> vector<2x96xf32>
    %178 = vector.broadcast %8 : vector<1x96xf32> to vector<2x96xf32>
    %179 = arith.addf %177, %178 : vector<2x96xf32>
    %180 = vector.extract_strided_slice %176 {offsets = [0, 0], sizes = [2, 64], strides = [1, 1]} : vector<2x96xf32> to vector<2x64xf32>
    %181 = vector.extract_strided_slice %179 {offsets = [0, 0], sizes = [2, 64], strides = [1, 1]} : vector<2x96xf32> to vector<2x64xf32>
    %182 = arith.addf %180, %181 : vector<2x64xf32>
    %183 = arith.negf %182 : vector<2x64xf32>
    %184 = math.exp %183 : vector<2x64xf32>
    %cst_50 = arith.constant 1.000000e+00 : f32
    %185 = vector.broadcast %cst_50 : f32 to vector<2x64xf32>
    %186 = arith.addf %185, %184 : vector<2x64xf32>
    %187 = arith.divf %185, %186 : vector<2x64xf32>
    %188 = vector.extract_strided_slice %187 {offsets = [0, 0], sizes = [2, 32], strides = [1, 1]} : vector<2x64xf32> to vector<2x32xf32>
    %189 = vector.extract_strided_slice %187 {offsets = [0, 32], sizes = [2, 32], strides = [1, 1]} : vector<2x64xf32> to vector<2x32xf32>
    %190 = vector.extract_strided_slice %176 {offsets = [0, 64], sizes = [2, 32], strides = [1, 1]} : vector<2x96xf32> to vector<2x32xf32>
    %191 = vector.extract_strided_slice %179 {offsets = [0, 64], sizes = [2, 32], strides = [1, 1]} : vector<2x96xf32> to vector<2x32xf32>
    %192 = arith.mulf %188, %191 : vector<2x32xf32>
    %193 = arith.addf %190, %192 : vector<2x32xf32>
    %194 = math.tanh %193 : vector<2x32xf32>
    %cst_51 = arith.constant 1.000000e+00 : f32
    %195 = vector.broadcast %cst_51 : f32 to vector<2x32xf32>
    %196 = arith.subf %195, %189 : vector<2x32xf32>
    %197 = arith.mulf %196, %194 : vector<2x32xf32>
    %198 = arith.mulf %189, %150 : vector<2x32xf32>
    %199 = arith.addf %197, %198 : vector<2x32xf32>
    %cst_52 = arith.constant dense<0.000000e+00> : vector<2x96xf32>
    %200 = tpu.matmul %173, %2, %cst_52 {dimension_numbers = #tpu.dot_dimension_numbers<[1], [0], [0], [1], [0, 0, 1, 1], [], []>} : vector<2x32xf32>, vector<32x96xf32>, vector<2x96xf32> -> vector<2x96xf32>
    %201 = vector.broadcast %4 : vector<1x96xf32> to vector<2x96xf32>
    %202 = arith.addf %200, %201 : vector<2x96xf32>
    %203 = vector.extract_strided_slice %32 {offsets = [0, 0], sizes = [2, 64], strides = [1, 1]} : vector<2x96xf32> to vector<2x64xf32>
    %204 = vector.extract_strided_slice %202 {offsets = [0, 0], sizes = [2, 64], strides = [1, 1]} : vector<2x96xf32> to vector<2x64xf32>
    %205 = arith.addf %203, %204 : vector<2x64xf32>
    %206 = arith.negf %205 : vector<2x64xf32>
    %207 = math.exp %206 : vector<2x64xf32>
    %cst_53 = arith.constant 1.000000e+00 : f32
    %208 = vector.broadcast %cst_53 : f32 to vector<2x64xf32>
    %209 = arith.addf %208, %207 : vector<2x64xf32>
    %210 = arith.divf %208, %209 : vector<2x64xf32>
    %211 = vector.extract_strided_slice %210 {offsets = [0, 0], sizes = [2, 32], strides = [1, 1]} : vector<2x64xf32> to vector<2x32xf32>
    %212 = vector.extract_strided_slice %210 {offsets = [0, 32], sizes = [2, 32], strides = [1, 1]} : vector<2x64xf32> to vector<2x32xf32>
    %213 = vector.extract_strided_slice %32 {offsets = [0, 64], sizes = [2, 32], strides = [1, 1]} : vector<2x96xf32> to vector<2x32xf32>
    %214 = vector.extract_strided_slice %202 {offsets = [0, 64], sizes = [2, 32], strides = [1, 1]} : vector<2x96xf32> to vector<2x32xf32>
    %215 = arith.mulf %211, %214 : vector<2x32xf32>
    %216 = arith.addf %213, %215 : vector<2x32xf32>
    %217 = math.tanh %216 : vector<2x32xf32>
    %cst_54 = arith.constant 1.000000e+00 : f32
    %218 = vector.broadcast %cst_54 : f32 to vector<2x32xf32>
    %219 = arith.subf %218, %212 : vector<2x32xf32>
    %220 = arith.mulf %219, %217 : vector<2x32xf32>
    %221 = arith.mulf %212, %173 : vector<2x32xf32>
    %222 = arith.addf %220, %221 : vector<2x32xf32>
    %cst_55 = arith.constant dense<0.000000e+00> : vector<2x96xf32>
    %223 = tpu.matmul %222, %5, %cst_55 {dimension_numbers = #tpu.dot_dimension_numbers<[1], [0], [0], [1], [0, 0, 1, 1], [], []>} : vector<2x32xf32>, vector<32x96xf32>, vector<2x96xf32> -> vector<2x96xf32>
    %224 = vector.broadcast %7 : vector<1x96xf32> to vector<2x96xf32>
    %225 = arith.addf %223, %224 : vector<2x96xf32>
    %cst_56 = arith.constant dense<0.000000e+00> : vector<2x96xf32>
    %226 = tpu.matmul %199, %6, %cst_56 {dimension_numbers = #tpu.dot_dimension_numbers<[1], [0], [0], [1], [0, 0, 1, 1], [], []>} : vector<2x32xf32>, vector<32x96xf32>, vector<2x96xf32> -> vector<2x96xf32>
    %227 = vector.broadcast %8 : vector<1x96xf32> to vector<2x96xf32>
    %228 = arith.addf %226, %227 : vector<2x96xf32>
    %229 = vector.extract_strided_slice %225 {offsets = [0, 0], sizes = [2, 64], strides = [1, 1]} : vector<2x96xf32> to vector<2x64xf32>
    %230 = vector.extract_strided_slice %228 {offsets = [0, 0], sizes = [2, 64], strides = [1, 1]} : vector<2x96xf32> to vector<2x64xf32>
    %231 = arith.addf %229, %230 : vector<2x64xf32>
    %232 = arith.negf %231 : vector<2x64xf32>
    %233 = math.exp %232 : vector<2x64xf32>
    %cst_57 = arith.constant 1.000000e+00 : f32
    %234 = vector.broadcast %cst_57 : f32 to vector<2x64xf32>
    %235 = arith.addf %234, %233 : vector<2x64xf32>
    %236 = arith.divf %234, %235 : vector<2x64xf32>
    %237 = vector.extract_strided_slice %236 {offsets = [0, 0], sizes = [2, 32], strides = [1, 1]} : vector<2x64xf32> to vector<2x32xf32>
    %238 = vector.extract_strided_slice %236 {offsets = [0, 32], sizes = [2, 32], strides = [1, 1]} : vector<2x64xf32> to vector<2x32xf32>
    %239 = vector.extract_strided_slice %225 {offsets = [0, 64], sizes = [2, 32], strides = [1, 1]} : vector<2x96xf32> to vector<2x32xf32>
    %240 = vector.extract_strided_slice %228 {offsets = [0, 64], sizes = [2, 32], strides = [1, 1]} : vector<2x96xf32> to vector<2x32xf32>
    %241 = arith.mulf %237, %240 : vector<2x32xf32>
    %242 = arith.addf %239, %241 : vector<2x32xf32>
    %243 = math.tanh %242 : vector<2x32xf32>
    %cst_58 = arith.constant 1.000000e+00 : f32
    %244 = vector.broadcast %cst_58 : f32 to vector<2x32xf32>
    %245 = arith.subf %244, %238 : vector<2x32xf32>
    %246 = arith.mulf %245, %243 : vector<2x32xf32>
    %247 = arith.mulf %238, %199 : vector<2x32xf32>
    %248 = arith.addf %246, %247 : vector<2x32xf32>
    %cst_59 = arith.constant dense<0.000000e+00> : vector<2x96xf32>
    %249 = tpu.matmul %222, %2, %cst_59 {dimension_numbers = #tpu.dot_dimension_numbers<[1], [0], [0], [1], [0, 0, 1, 1], [], []>} : vector<2x32xf32>, vector<32x96xf32>, vector<2x96xf32> -> vector<2x96xf32>
    %250 = vector.broadcast %4 : vector<1x96xf32> to vector<2x96xf32>
    %251 = arith.addf %249, %250 : vector<2x96xf32>
    %252 = vector.extract_strided_slice %37 {offsets = [0, 0], sizes = [2, 64], strides = [1, 1]} : vector<2x96xf32> to vector<2x64xf32>
    %253 = vector.extract_strided_slice %251 {offsets = [0, 0], sizes = [2, 64], strides = [1, 1]} : vector<2x96xf32> to vector<2x64xf32>
    %254 = arith.addf %252, %253 : vector<2x64xf32>
    %255 = arith.negf %254 : vector<2x64xf32>
    %256 = math.exp %255 : vector<2x64xf32>
    %cst_60 = arith.constant 1.000000e+00 : f32
    %257 = vector.broadcast %cst_60 : f32 to vector<2x64xf32>
    %258 = arith.addf %257, %256 : vector<2x64xf32>
    %259 = arith.divf %257, %258 : vector<2x64xf32>
    %260 = vector.extract_strided_slice %259 {offsets = [0, 0], sizes = [2, 32], strides = [1, 1]} : vector<2x64xf32> to vector<2x32xf32>
    %261 = vector.extract_strided_slice %259 {offsets = [0, 32], sizes = [2, 32], strides = [1, 1]} : vector<2x64xf32> to vector<2x32xf32>
    %262 = vector.extract_strided_slice %37 {offsets = [0, 64], sizes = [2, 32], strides = [1, 1]} : vector<2x96xf32> to vector<2x32xf32>
    %263 = vector.extract_strided_slice %251 {offsets = [0, 64], sizes = [2, 32], strides = [1, 1]} : vector<2x96xf32> to vector<2x32xf32>
    %264 = arith.mulf %260, %263 : vector<2x32xf32>
    %265 = arith.addf %262, %264 : vector<2x32xf32>
    %266 = math.tanh %265 : vector<2x32xf32>
    %cst_61 = arith.constant 1.000000e+00 : f32
    %267 = vector.broadcast %cst_61 : f32 to vector<2x32xf32>
    %268 = arith.subf %267, %261 : vector<2x32xf32>
    %269 = arith.mulf %268, %266 : vector<2x32xf32>
    %270 = arith.mulf %261, %222 : vector<2x32xf32>
    %271 = arith.addf %269, %270 : vector<2x32xf32>
    %cst_62 = arith.constant dense<0.000000e+00> : vector<2x96xf32>
    %272 = tpu.matmul %271, %5, %cst_62 {dimension_numbers = #tpu.dot_dimension_numbers<[1], [0], [0], [1], [0, 0, 1, 1], [], []>} : vector<2x32xf32>, vector<32x96xf32>, vector<2x96xf32> -> vector<2x96xf32>
    %273 = vector.broadcast %7 : vector<1x96xf32> to vector<2x96xf32>
    %274 = arith.addf %272, %273 : vector<2x96xf32>
    %cst_63 = arith.constant dense<0.000000e+00> : vector<2x96xf32>
    %275 = tpu.matmul %248, %6, %cst_63 {dimension_numbers = #tpu.dot_dimension_numbers<[1], [0], [0], [1], [0, 0, 1, 1], [], []>} : vector<2x32xf32>, vector<32x96xf32>, vector<2x96xf32> -> vector<2x96xf32>
    %276 = vector.broadcast %8 : vector<1x96xf32> to vector<2x96xf32>
    %277 = arith.addf %275, %276 : vector<2x96xf32>
    %278 = vector.extract_strided_slice %274 {offsets = [0, 0], sizes = [2, 64], strides = [1, 1]} : vector<2x96xf32> to vector<2x64xf32>
    %279 = vector.extract_strided_slice %277 {offsets = [0, 0], sizes = [2, 64], strides = [1, 1]} : vector<2x96xf32> to vector<2x64xf32>
    %280 = arith.addf %278, %279 : vector<2x64xf32>
    %281 = arith.negf %280 : vector<2x64xf32>
    %282 = math.exp %281 : vector<2x64xf32>
    %cst_64 = arith.constant 1.000000e+00 : f32
    %283 = vector.broadcast %cst_64 : f32 to vector<2x64xf32>
    %284 = arith.addf %283, %282 : vector<2x64xf32>
    %285 = arith.divf %283, %284 : vector<2x64xf32>
    %286 = vector.extract_strided_slice %285 {offsets = [0, 0], sizes = [2, 32], strides = [1, 1]} : vector<2x64xf32> to vector<2x32xf32>
    %287 = vector.extract_strided_slice %285 {offsets = [0, 32], sizes = [2, 32], strides = [1, 1]} : vector<2x64xf32> to vector<2x32xf32>
    %288 = vector.extract_strided_slice %274 {offsets = [0, 64], sizes = [2, 32], strides = [1, 1]} : vector<2x96xf32> to vector<2x32xf32>
    %289 = vector.extract_strided_slice %277 {offsets = [0, 64], sizes = [2, 32], strides = [1, 1]} : vector<2x96xf32> to vector<2x32xf32>
    %290 = arith.mulf %286, %289 : vector<2x32xf32>
    %291 = arith.addf %288, %290 : vector<2x32xf32>
    %292 = math.tanh %291 : vector<2x32xf32>
    %cst_65 = arith.constant 1.000000e+00 : f32
    %293 = vector.broadcast %cst_65 : f32 to vector<2x32xf32>
    %294 = arith.subf %293, %287 : vector<2x32xf32>
    %295 = arith.mulf %294, %292 : vector<2x32xf32>
    %296 = arith.mulf %287, %248 : vector<2x32xf32>
    %297 = arith.addf %295, %296 : vector<2x32xf32>
    %cst_66 = arith.constant dense<0.000000e+00> : vector<2x96xf32>
    %298 = tpu.matmul %271, %2, %cst_66 {dimension_numbers = #tpu.dot_dimension_numbers<[1], [0], [0], [1], [0, 0, 1, 1], [], []>} : vector<2x32xf32>, vector<32x96xf32>, vector<2x96xf32> -> vector<2x96xf32>
    %299 = vector.broadcast %4 : vector<1x96xf32> to vector<2x96xf32>
    %300 = arith.addf %298, %299 : vector<2x96xf32>
    %301 = vector.extract_strided_slice %42 {offsets = [0, 0], sizes = [2, 64], strides = [1, 1]} : vector<2x96xf32> to vector<2x64xf32>
    %302 = vector.extract_strided_slice %300 {offsets = [0, 0], sizes = [2, 64], strides = [1, 1]} : vector<2x96xf32> to vector<2x64xf32>
    %303 = arith.addf %301, %302 : vector<2x64xf32>
    %304 = arith.negf %303 : vector<2x64xf32>
    %305 = math.exp %304 : vector<2x64xf32>
    %cst_67 = arith.constant 1.000000e+00 : f32
    %306 = vector.broadcast %cst_67 : f32 to vector<2x64xf32>
    %307 = arith.addf %306, %305 : vector<2x64xf32>
    %308 = arith.divf %306, %307 : vector<2x64xf32>
    %309 = vector.extract_strided_slice %308 {offsets = [0, 0], sizes = [2, 32], strides = [1, 1]} : vector<2x64xf32> to vector<2x32xf32>
    %310 = vector.extract_strided_slice %308 {offsets = [0, 32], sizes = [2, 32], strides = [1, 1]} : vector<2x64xf32> to vector<2x32xf32>
    %311 = vector.extract_strided_slice %42 {offsets = [0, 64], sizes = [2, 32], strides = [1, 1]} : vector<2x96xf32> to vector<2x32xf32>
    %312 = vector.extract_strided_slice %300 {offsets = [0, 64], sizes = [2, 32], strides = [1, 1]} : vector<2x96xf32> to vector<2x32xf32>
    %313 = arith.mulf %309, %312 : vector<2x32xf32>
    %314 = arith.addf %311, %313 : vector<2x32xf32>
    %315 = math.tanh %314 : vector<2x32xf32>
    %cst_68 = arith.constant 1.000000e+00 : f32
    %316 = vector.broadcast %cst_68 : f32 to vector<2x32xf32>
    %317 = arith.subf %316, %310 : vector<2x32xf32>
    %318 = arith.mulf %317, %315 : vector<2x32xf32>
    %319 = arith.mulf %310, %271 : vector<2x32xf32>
    %320 = arith.addf %318, %319 : vector<2x32xf32>
    %cst_69 = arith.constant dense<0.000000e+00> : vector<2x96xf32>
    %321 = tpu.matmul %320, %5, %cst_69 {dimension_numbers = #tpu.dot_dimension_numbers<[1], [0], [0], [1], [0, 0, 1, 1], [], []>} : vector<2x32xf32>, vector<32x96xf32>, vector<2x96xf32> -> vector<2x96xf32>
    %322 = vector.broadcast %7 : vector<1x96xf32> to vector<2x96xf32>
    %323 = arith.addf %321, %322 : vector<2x96xf32>
    %cst_70 = arith.constant dense<0.000000e+00> : vector<2x96xf32>
    %324 = tpu.matmul %297, %6, %cst_70 {dimension_numbers = #tpu.dot_dimension_numbers<[1], [0], [0], [1], [0, 0, 1, 1], [], []>} : vector<2x32xf32>, vector<32x96xf32>, vector<2x96xf32> -> vector<2x96xf32>
    %325 = vector.broadcast %8 : vector<1x96xf32> to vector<2x96xf32>
    %326 = arith.addf %324, %325 : vector<2x96xf32>
    %327 = vector.extract_strided_slice %323 {offsets = [0, 0], sizes = [2, 64], strides = [1, 1]} : vector<2x96xf32> to vector<2x64xf32>
    %328 = vector.extract_strided_slice %326 {offsets = [0, 0], sizes = [2, 64], strides = [1, 1]} : vector<2x96xf32> to vector<2x64xf32>
    %329 = arith.addf %327, %328 : vector<2x64xf32>
    %330 = arith.negf %329 : vector<2x64xf32>
    %331 = math.exp %330 : vector<2x64xf32>
    %cst_71 = arith.constant 1.000000e+00 : f32
    %332 = vector.broadcast %cst_71 : f32 to vector<2x64xf32>
    %333 = arith.addf %332, %331 : vector<2x64xf32>
    %334 = arith.divf %332, %333 : vector<2x64xf32>
    %335 = vector.extract_strided_slice %334 {offsets = [0, 0], sizes = [2, 32], strides = [1, 1]} : vector<2x64xf32> to vector<2x32xf32>
    %336 = vector.extract_strided_slice %334 {offsets = [0, 32], sizes = [2, 32], strides = [1, 1]} : vector<2x64xf32> to vector<2x32xf32>
    %337 = vector.extract_strided_slice %323 {offsets = [0, 64], sizes = [2, 32], strides = [1, 1]} : vector<2x96xf32> to vector<2x32xf32>
    %338 = vector.extract_strided_slice %326 {offsets = [0, 64], sizes = [2, 32], strides = [1, 1]} : vector<2x96xf32> to vector<2x32xf32>
    %339 = arith.mulf %335, %338 : vector<2x32xf32>
    %340 = arith.addf %337, %339 : vector<2x32xf32>
    %341 = math.tanh %340 : vector<2x32xf32>
    %cst_72 = arith.constant 1.000000e+00 : f32
    %342 = vector.broadcast %cst_72 : f32 to vector<2x32xf32>
    %343 = arith.subf %342, %336 : vector<2x32xf32>
    %344 = arith.mulf %343, %341 : vector<2x32xf32>
    %345 = arith.mulf %336, %297 : vector<2x32xf32>
    %346 = arith.addf %344, %345 : vector<2x32xf32>
    %cst_73 = arith.constant dense<0.000000e+00> : vector<2x96xf32>
    %347 = tpu.matmul %320, %2, %cst_73 {dimension_numbers = #tpu.dot_dimension_numbers<[1], [0], [0], [1], [0, 0, 1, 1], [], []>} : vector<2x32xf32>, vector<32x96xf32>, vector<2x96xf32> -> vector<2x96xf32>
    %348 = vector.broadcast %4 : vector<1x96xf32> to vector<2x96xf32>
    %349 = arith.addf %347, %348 : vector<2x96xf32>
    %350 = vector.extract_strided_slice %47 {offsets = [0, 0], sizes = [2, 64], strides = [1, 1]} : vector<2x96xf32> to vector<2x64xf32>
    %351 = vector.extract_strided_slice %349 {offsets = [0, 0], sizes = [2, 64], strides = [1, 1]} : vector<2x96xf32> to vector<2x64xf32>
    %352 = arith.addf %350, %351 : vector<2x64xf32>
    %353 = arith.negf %352 : vector<2x64xf32>
    %354 = math.exp %353 : vector<2x64xf32>
    %cst_74 = arith.constant 1.000000e+00 : f32
    %355 = vector.broadcast %cst_74 : f32 to vector<2x64xf32>
    %356 = arith.addf %355, %354 : vector<2x64xf32>
    %357 = arith.divf %355, %356 : vector<2x64xf32>
    %358 = vector.extract_strided_slice %357 {offsets = [0, 0], sizes = [2, 32], strides = [1, 1]} : vector<2x64xf32> to vector<2x32xf32>
    %359 = vector.extract_strided_slice %357 {offsets = [0, 32], sizes = [2, 32], strides = [1, 1]} : vector<2x64xf32> to vector<2x32xf32>
    %360 = vector.extract_strided_slice %47 {offsets = [0, 64], sizes = [2, 32], strides = [1, 1]} : vector<2x96xf32> to vector<2x32xf32>
    %361 = vector.extract_strided_slice %349 {offsets = [0, 64], sizes = [2, 32], strides = [1, 1]} : vector<2x96xf32> to vector<2x32xf32>
    %362 = arith.mulf %358, %361 : vector<2x32xf32>
    %363 = arith.addf %360, %362 : vector<2x32xf32>
    %364 = math.tanh %363 : vector<2x32xf32>
    %cst_75 = arith.constant 1.000000e+00 : f32
    %365 = vector.broadcast %cst_75 : f32 to vector<2x32xf32>
    %366 = arith.subf %365, %359 : vector<2x32xf32>
    %367 = arith.mulf %366, %364 : vector<2x32xf32>
    %368 = arith.mulf %359, %320 : vector<2x32xf32>
    %369 = arith.addf %367, %368 : vector<2x32xf32>
    %cst_76 = arith.constant dense<0.000000e+00> : vector<2x96xf32>
    %370 = tpu.matmul %369, %5, %cst_76 {dimension_numbers = #tpu.dot_dimension_numbers<[1], [0], [0], [1], [0, 0, 1, 1], [], []>} : vector<2x32xf32>, vector<32x96xf32>, vector<2x96xf32> -> vector<2x96xf32>
    %371 = vector.broadcast %7 : vector<1x96xf32> to vector<2x96xf32>
    %372 = arith.addf %370, %371 : vector<2x96xf32>
    %cst_77 = arith.constant dense<0.000000e+00> : vector<2x96xf32>
    %373 = tpu.matmul %346, %6, %cst_77 {dimension_numbers = #tpu.dot_dimension_numbers<[1], [0], [0], [1], [0, 0, 1, 1], [], []>} : vector<2x32xf32>, vector<32x96xf32>, vector<2x96xf32> -> vector<2x96xf32>
    %374 = vector.broadcast %8 : vector<1x96xf32> to vector<2x96xf32>
    %375 = arith.addf %373, %374 : vector<2x96xf32>
    %376 = vector.extract_strided_slice %372 {offsets = [0, 0], sizes = [2, 64], strides = [1, 1]} : vector<2x96xf32> to vector<2x64xf32>
    %377 = vector.extract_strided_slice %375 {offsets = [0, 0], sizes = [2, 64], strides = [1, 1]} : vector<2x96xf32> to vector<2x64xf32>
    %378 = arith.addf %376, %377 : vector<2x64xf32>
    %379 = arith.negf %378 : vector<2x64xf32>
    %380 = math.exp %379 : vector<2x64xf32>
    %cst_78 = arith.constant 1.000000e+00 : f32
    %381 = vector.broadcast %cst_78 : f32 to vector<2x64xf32>
    %382 = arith.addf %381, %380 : vector<2x64xf32>
    %383 = arith.divf %381, %382 : vector<2x64xf32>
    %384 = vector.extract_strided_slice %383 {offsets = [0, 0], sizes = [2, 32], strides = [1, 1]} : vector<2x64xf32> to vector<2x32xf32>
    %385 = vector.extract_strided_slice %383 {offsets = [0, 32], sizes = [2, 32], strides = [1, 1]} : vector<2x64xf32> to vector<2x32xf32>
    %386 = vector.extract_strided_slice %372 {offsets = [0, 64], sizes = [2, 32], strides = [1, 1]} : vector<2x96xf32> to vector<2x32xf32>
    %387 = vector.extract_strided_slice %375 {offsets = [0, 64], sizes = [2, 32], strides = [1, 1]} : vector<2x96xf32> to vector<2x32xf32>
    %388 = arith.mulf %384, %387 : vector<2x32xf32>
    %389 = arith.addf %386, %388 : vector<2x32xf32>
    %390 = math.tanh %389 : vector<2x32xf32>
    %cst_79 = arith.constant 1.000000e+00 : f32
    %391 = vector.broadcast %cst_79 : f32 to vector<2x32xf32>
    %392 = arith.subf %391, %385 : vector<2x32xf32>
    %393 = arith.mulf %392, %390 : vector<2x32xf32>
    %394 = arith.mulf %385, %346 : vector<2x32xf32>
    %395 = arith.addf %393, %394 : vector<2x32xf32>
    %cst_80 = arith.constant dense<0.000000e+00> : vector<2x96xf32>
    %396 = tpu.matmul %369, %2, %cst_80 {dimension_numbers = #tpu.dot_dimension_numbers<[1], [0], [0], [1], [0, 0, 1, 1], [], []>} : vector<2x32xf32>, vector<32x96xf32>, vector<2x96xf32> -> vector<2x96xf32>
    %397 = vector.broadcast %4 : vector<1x96xf32> to vector<2x96xf32>
    %398 = arith.addf %396, %397 : vector<2x96xf32>
    %399 = vector.extract_strided_slice %52 {offsets = [0, 0], sizes = [2, 64], strides = [1, 1]} : vector<2x96xf32> to vector<2x64xf32>
    %400 = vector.extract_strided_slice %398 {offsets = [0, 0], sizes = [2, 64], strides = [1, 1]} : vector<2x96xf32> to vector<2x64xf32>
    %401 = arith.addf %399, %400 : vector<2x64xf32>
    %402 = arith.negf %401 : vector<2x64xf32>
    %403 = math.exp %402 : vector<2x64xf32>
    %cst_81 = arith.constant 1.000000e+00 : f32
    %404 = vector.broadcast %cst_81 : f32 to vector<2x64xf32>
    %405 = arith.addf %404, %403 : vector<2x64xf32>
    %406 = arith.divf %404, %405 : vector<2x64xf32>
    %407 = vector.extract_strided_slice %406 {offsets = [0, 0], sizes = [2, 32], strides = [1, 1]} : vector<2x64xf32> to vector<2x32xf32>
    %408 = vector.extract_strided_slice %406 {offsets = [0, 32], sizes = [2, 32], strides = [1, 1]} : vector<2x64xf32> to vector<2x32xf32>
    %409 = vector.extract_strided_slice %52 {offsets = [0, 64], sizes = [2, 32], strides = [1, 1]} : vector<2x96xf32> to vector<2x32xf32>
    %410 = vector.extract_strided_slice %398 {offsets = [0, 64], sizes = [2, 32], strides = [1, 1]} : vector<2x96xf32> to vector<2x32xf32>
    %411 = arith.mulf %407, %410 : vector<2x32xf32>
    %412 = arith.addf %409, %411 : vector<2x32xf32>
    %413 = math.tanh %412 : vector<2x32xf32>
    %cst_82 = arith.constant 1.000000e+00 : f32
    %414 = vector.broadcast %cst_82 : f32 to vector<2x32xf32>
    %415 = arith.subf %414, %408 : vector<2x32xf32>
    %416 = arith.mulf %415, %413 : vector<2x32xf32>
    %417 = arith.mulf %408, %369 : vector<2x32xf32>
    %418 = arith.addf %416, %417 : vector<2x32xf32>
    %cst_83 = arith.constant dense<0.000000e+00> : vector<2x96xf32>
    %419 = tpu.matmul %418, %5, %cst_83 {dimension_numbers = #tpu.dot_dimension_numbers<[1], [0], [0], [1], [0, 0, 1, 1], [], []>} : vector<2x32xf32>, vector<32x96xf32>, vector<2x96xf32> -> vector<2x96xf32>
    %420 = vector.broadcast %7 : vector<1x96xf32> to vector<2x96xf32>
    %421 = arith.addf %419, %420 : vector<2x96xf32>
    %cst_84 = arith.constant dense<0.000000e+00> : vector<2x96xf32>
    %422 = tpu.matmul %395, %6, %cst_84 {dimension_numbers = #tpu.dot_dimension_numbers<[1], [0], [0], [1], [0, 0, 1, 1], [], []>} : vector<2x32xf32>, vector<32x96xf32>, vector<2x96xf32> -> vector<2x96xf32>
    %423 = vector.broadcast %8 : vector<1x96xf32> to vector<2x96xf32>
    %424 = arith.addf %422, %423 : vector<2x96xf32>
    %425 = vector.extract_strided_slice %421 {offsets = [0, 0], sizes = [2, 64], strides = [1, 1]} : vector<2x96xf32> to vector<2x64xf32>
    %426 = vector.extract_strided_slice %424 {offsets = [0, 0], sizes = [2, 64], strides = [1, 1]} : vector<2x96xf32> to vector<2x64xf32>
    %427 = arith.addf %425, %426 : vector<2x64xf32>
    %428 = arith.negf %427 : vector<2x64xf32>
    %429 = math.exp %428 : vector<2x64xf32>
    %cst_85 = arith.constant 1.000000e+00 : f32
    %430 = vector.broadcast %cst_85 : f32 to vector<2x64xf32>
    %431 = arith.addf %430, %429 : vector<2x64xf32>
    %432 = arith.divf %430, %431 : vector<2x64xf32>
    %433 = vector.extract_strided_slice %432 {offsets = [0, 0], sizes = [2, 32], strides = [1, 1]} : vector<2x64xf32> to vector<2x32xf32>
    %434 = vector.extract_strided_slice %432 {offsets = [0, 32], sizes = [2, 32], strides = [1, 1]} : vector<2x64xf32> to vector<2x32xf32>
    %435 = vector.extract_strided_slice %421 {offsets = [0, 64], sizes = [2, 32], strides = [1, 1]} : vector<2x96xf32> to vector<2x32xf32>
    %436 = vector.extract_strided_slice %424 {offsets = [0, 64], sizes = [2, 32], strides = [1, 1]} : vector<2x96xf32> to vector<2x32xf32>
    %437 = arith.mulf %433, %436 : vector<2x32xf32>
    %438 = arith.addf %435, %437 : vector<2x32xf32>
    %439 = math.tanh %438 : vector<2x32xf32>
    %cst_86 = arith.constant 1.000000e+00 : f32
    %440 = vector.broadcast %cst_86 : f32 to vector<2x32xf32>
    %441 = arith.subf %440, %434 : vector<2x32xf32>
    %442 = arith.mulf %441, %439 : vector<2x32xf32>
    %443 = arith.mulf %434, %395 : vector<2x32xf32>
    %444 = arith.addf %442, %443 : vector<2x32xf32>
    %cst_87 = arith.constant dense<0.000000e+00> : vector<2x2xf32>
    %445 = tpu.matmul %444, %9, %cst_87 {dimension_numbers = #tpu.dot_dimension_numbers<[1], [0], [0], [1], [0, 0, 1, 1], [], []>} : vector<2x32xf32>, vector<32x2xf32>, vector<2x2xf32> -> vector<2x2xf32>
    %446 = vector.broadcast %10 : vector<1x2xf32> to vector<2x2xf32>
    %447 = arith.addf %445, %446 : vector<2x2xf32>
    %c0_88 = arith.constant 0 : index
    %c0_89 = arith.constant 0 : index
    %448 = vector.load %arg11[%c0_88, %c0_89] : memref<2x2xf32, #tpu.memory_space<vmem>>, vector<2x2xf32>
    tpu.vector_store %arg11[%c0_88, %c0_89], %447 {strides = array<i32>} : memref<2x2xf32, #tpu.memory_space<vmem>>, vector<2x2xf32>,
    return
  }
}

</mosaic_0001>

<bundles_post_ra>
// kernel: mcts_value_net.1
= control target key start
LH: loop header
LB: loop body
LE: loop exit
PB: predicated region body
PF: predicated region fallthrough
CT: control target
= control target key end

     0   :  { %16 = vsyncpa [#allocation3], 0  ;;  %s4618_s0 = inlined_call_operand.vmem [shape: f32[2,8,32], index: 0, kind: input, shape index: {}]   ;;  %s4619_s1 = inlined_call_operand.vmem [shape: f32[32,96], index: 1, kind: input, shape index: {}]   ;;  %s4620_s2 = inlined_call_operand.hbm [shape: f32[32,96], index: 2, kind: input, shape index: {}]   ;;  %s4621_s3 = inlined_call_operand.vmem [shape: f32[1,96], index: 3, kind: input, shape index: {}]   ;;  %s4622_s4 = inlined_call_operand.vmem [shape: f32[1,96], index: 4, kind: input, shape index: {}]   ;;  %s4623_s5 = inlined_call_operand.hbm [shape: f32[32,96], index: 5, kind: input, shape index: {}]   ;;  %s4624_s6 = inlined_call_operand.hbm [shape: f32[32,96], index: 6, kind: input, shape index: {}]   ;;  %s4625_s7 = inlined_call_operand.hbm [shape: f32[1,96], index: 7, kind: input, shape index: {}]   ;;  %s4626_s8 = inlined_call_operand.hbm [shape: f32[1,96], index: 8, kind: input, shape index: {}]   ;;  %s4627_s9 = inlined_call_operand.vmem [shape: f32[32,2], index: 9, kind: input, shape index: {}]   ;;  %s4628_s10 = inlined_call_operand.hbm [shape: f32[1,2], index: 10, kind: input, shape index: {}]   ;;  %s4629_s11 = inlined_call_operand.vmem [shape: f32[2,2], index: 11, kind: output, shape index: {}]  }
   0x1   :  { %17 = vsyncpa [#allocation5], 0 }
   0x2   :  { %18 = vsyncpa [#allocation8], 0 }
   0x3   :  { %19 = vsyncpa [#allocation11], 0  ;;  %s3864_s17 = smov [#allocation4]   ;;  %s3865_s19 = smov [#allocation7]  }
   0x4   :  { %s45_s18 = sshll.u32 %s3864_s17, 4  ;;  %s70_s20 = sshll.u32 %s3865_s19, 4  ;;  %s46_s18 = int_to_ptr.vmem [resolvable:$true] %s45_s18  ;;  %s71_s20 = int_to_ptr.vmem [resolvable:$true] %s70_s20 }
   0x5   :  { %s3744_s21 = scalar_lea.vmem %s46_s18, 512  ;;  %p3749_p1 = scmp.lt.s32.totalorder %s46_s18, %s46_s18 }
   0x6   :  { %p3745_p0 = scmp.ne.s32.totalorder %s46_s18, %s3744_s21  ;;  %p3750_p2 = scmp.lt.s32.totalorder %s3744_s21, %s3744_s21 }
   0x8   :  { %p3751_p3 = por %p3750_p2, %p3749_p1 }
   0xa   :  { %p3752_p4 = pnand %p3751_p3, %p3745_p0 }
   0xc   :  { %3755 = shalt.err (!%p3752_p4)
}
   0xd   :  { %s3866_s22 = smov 128   ;;  %s3867_s23 = smov 8  }
   0xe   :  { %51 = dma.hbm_to_vmem [thread:$0]  %s4623_s5, 512, %s46_s18, [#allocation5], %s3866_s22, %s3866_s22, %s3867_s23  }
   0xf   :  { %s3764_s26 = scalar_lea.vmem %s71_s20, 16  ;;  %s3768_s27 = scalar_lea.vmem %s71_s20, 32 }
  0x10   :  { %p3765_p5 = scmp.ne.s32.totalorder %s71_s20, %s3764_s26  ;;  %p3769_p6 = scmp.lt.s32.totalorder %s71_s20, %s71_s20 }
  0x11   :  { %p3770_p7 = scmp.lt.s32.totalorder %s3768_s27, %s3764_s26 }
  0x13   :  { %p3771_p8 = por %p3770_p7, %p3769_p6 }
  0x15   :  { %p3772_p9 = pnand %p3771_p8, %p3765_p5 }
  0x17   :  { %3775 = shalt.err (!%p3772_p9)
}
  0x18   :  { %73 = dma.hbm_to_vmem [thread:$0]  %s4625_s7, 16, %s71_s20, [#allocation8]  }
  0x19   :  { %s3868_s30 = smov [#allocation2]   ;;  %s3869_s13 = smov [#allocation6]  }
  0x1a   :  { %s29_s12 = sshll.u32 %s3868_s30, 4  ;;  %s57_s14 = sshll.u32 %s3869_s13, 4  ;;  %s30_s12 = int_to_ptr.vmem [resolvable:$true] %s29_s12  ;;  %s58_s14 = int_to_ptr.vmem [resolvable:$true] %s57_s14 }
  0x1b   :  { %s3784_s15 = scalar_lea.vmem %s30_s12, 512  ;;  %p3789_p11 = scmp.lt.s32.totalorder %s30_s12, %s30_s12 }
  0x1c   :  { %p3785_p10 = scmp.ne.s32.totalorder %s30_s12, %s3784_s15  ;;  %p3790_p12 = scmp.lt.s32.totalorder %s3784_s15, %s3784_s15 }
  0x1e   :  { %p3791_p13 = por %p3790_p12, %p3789_p11 }
  0x20   :  { %p3792_p0 = pnand %p3791_p13, %p3785_p10 }
  0x22   :  { %3795 = shalt.err (!%p3792_p0)
}
  0x23   :  { %35 = dma.hbm_to_vmem [thread:$0]  %s4620_s2, 512, %s30_s12, [#allocation3], %s3866_s22, %s3866_s22, %s3867_s23  }
  0x24   :  { %s3804_s7 = scalar_lea.vmem %s58_s14, 512  ;;  %p3809_p2 = scmp.lt.s32.totalorder %s58_s14, %s58_s14 }
  0x25   :  { %p3805_p1 = scmp.ne.s32.totalorder %s58_s14, %s3804_s7  ;;  %p3810_p3 = scmp.lt.s32.totalorder %s3804_s7, %s3804_s7 }
  0x27   :  { %p3811_p4 = por %p3810_p3, %p3809_p2 }
  0x29   :  { %p3812_p5 = pnand %p3811_p4, %p3805_p1 }
  0x2b   :  { %3815 = shalt.err (!%p3812_p5)
}
  0x2c   :  { %63 = dma.hbm_to_vmem [thread:$0]  %s4624_s6, 512, %s58_s14, [#allocation5], %s3866_s22, %s3866_s22, %s3867_s23  }
  0x2d   :  { %s3870_s19 = smov [#allocation9]   ;;  %s3871_s21 = smov [#allocation10]  }
  0x2e   :  { %s80_s20 = sshll.u32 %s3870_s19, 4  ;;  %s92_s24 = sshll.u32 %s3871_s21, 4  ;;  %s81_s20 = int_to_ptr.vmem [resolvable:$true] %s80_s20  ;;  %s93_s24 = int_to_ptr.vmem [resolvable:$true] %s92_s24 }
  0x2f   :  { %s3824_s2 = scalar_lea.vmem %s81_s20, 16  ;;  %s3828_s25 = scalar_lea.vmem %s81_s20, 32 }
  0x30   :  { %p3825_p6 = scmp.ne.s32.totalorder %s81_s20, %s3824_s2  ;;  %p3829_p7 = scmp.lt.s32.totalorder %s81_s20, %s81_s20 }
  0x31   :  { %p3830_p8 = scmp.lt.s32.totalorder %s3828_s25, %s3824_s2 }
  0x33   :  { %p3831_p9 = por %p3830_p8, %p3829_p7 }
  0x35   :  { %p3832_p10 = pnand %p3831_p9, %p3825_p6 }
  0x37   :  { %3835 = shalt.err (!%p3832_p10)
}
  0x38   :  { %83 = dma.hbm_to_vmem [thread:$0]  %s4626_s8, 16, %s81_s20, [#allocation8]  }
  0x39   :  { %s3844_s28 = scalar_lea.vmem %s93_s24, 16  ;;  %s3848_s6 = scalar_lea.vmem %s93_s24, 32 }
  0x3a   :  { %p3845_p11 = scmp.ne.s32.totalorder %s93_s24, %s3844_s28  ;;  %p3849_p12 = scmp.lt.s32.totalorder %s93_s24, %s93_s24 }
  0x3b   :  { %p3850_p13 = scmp.lt.s32.totalorder %s3848_s6, %s3844_s28 }
  0x3d   :  { %p3851_p0 = por %p3850_p13, %p3849_p12 }
  0x3f   :  { %p3852_p1 = pnand %p3851_p0, %p3845_p11 }
  0x41   :  { %3855 = shalt.err (!%p3852_p1)
}
  0x42   :  { %95 = dma.hbm_to_vmem [thread:$0]  %s4628_s10, 16, %s93_s24, [#allocation11]  }
  0x43   :  { %3856 = dma.done.wait [#allocation3], 512  }
  0x44   :  { %3857 = vsyncadd [#allocation3], 4294966784 }
  0x45   :  { %3858 = dma.done.wait [#allocation5], 1024  }
  0x46   :  { %3859 = vsyncadd [#allocation5], 4294966272 }
  0x47   :  { %3860 = dma.done.wait [#allocation8], 32  }
  0x48   :  { %3861 = vsyncadd [#allocation8], 4294967264 }
  0x49   :  { %3862 = dma.done.wait [#allocation11], 16  }
  0x4a   :  { %3863 = vsyncadd [#allocation11], 4294967280  ;;  %v3872_v0 = vmov 0.0   ;;  %vm3873_vm0 = vmmov 0   ;;  %v3972_v1 = vld [vmem:[%s4619_s1 + $0x18] sm:$0xff]  ;;  %v3977_v2 = vld [vmem:[%s4619_s1 + $0x10] sm:$0xff] }
  0x4b   :  { %3249 = vmatprep.subr.mxu0 %v3872_v0  ;;  %3257 = vmatprep.mubr.msk.f32.mxu0 %vm3873_vm0, %v3872_v0  ;;  %v3983_v3 = vld [vmem:[%s4618_s0 + $0x8] sm:$0xff]  ;;  %v3995_v5 = vld [vmem:[%s4618_s0] sm:$0xff]  ;;  %vm150_vm1 = vcmask 1041409   ;;  %vm152_vm2 = vcmask 261120   ;;  %v4058_v18 = vld [vmem:[#allocation2 + $0x18] sm:$0xff]  ;;  %s3874_s18 = smov 64  }
  0x4c   :  { %3260 = vmatprep.subr.mxu1 %v3872_v0  ;;  %3268 = vmatprep.mubr.msk.f32.mxu1 %vm3873_vm0, %v3872_v0  ;;  %v3990_v4 = vld [vmem:[%s4619_s1 + $0x8] sm:$0xff]  ;;  %v149_v6 = vrot.slane %v3983_v3, 7  ;;  %v4005_v7 = vld [vmem:[%s4619_s1] sm:$0xff]  ;;  %v299_v9 = vrot.slane %v3995_v5, 2  ;;  %v300_v10 = vrot.slane %v3983_v3, 1  ;;  %v449_v12 = vrot.slane %v3995_v5, 4 }
  0x4d   :  { %3250 = vmatpush3.msra.mxu0 %v3972_v1  ;;  %3261 = vmatpush3.msra.mxu1 %v3972_v1  ;;  %v450_v13 = vrot.slane %v3983_v3, 3  ;;  %v599_v15 = vrot.slane %v3995_v5, 6  ;;  %v600_v16 = vrot.slane %v3983_v3, 5  ;;  %v4063_v19 = vld [vmem:[#allocation2 + $0x10] sm:$0xff]  ;;  %v4069_v20 = vld [vmem:[#allocation2 + $0x8] sm:$0xff]  ;;  %v4073_v21 = vld [vmem:[#allocation2] sm:$0xff] }
  0x4e   :  { %3251 = vmatprep.subr.mxu0 %v3872_v0  ;;  %3262 = vmatprep.subr.mxu1 %v3872_v0  ;;  %v151_v8 = vsel %vm150_vm1, %v149_v6, %v3995_v5  ;;  %v301_v11 = vsel %vm150_vm1, %v300_v10, %v299_v9  ;;  %v4091_v30 = vld [vmem:[%s4622_s4] ss:$0 sm:$0xff]  ;;  %v4105_v45 = vld [vmem:[#allocation6 + $0x18] sm:$0xff]  ;;  %v4107_v46 = vld [vmem:[#allocation6 + $0x10] sm:$0xff]  ;;  %v225_v47 = vrot.slane %v3995_v5, 1  ;;  %v374_v51 = vrot.slane %v3995_v5, 3 }
  0x4f   :  { %3252 = vmatpush3.msra.mxu0 %v3977_v2  ;;  %3263 = vmatpush3.msra.mxu1 %v3977_v2  ;;  %v451_v14 = vsel %vm150_vm1, %v450_v13, %v449_v12  ;;  %v601_v17 = vsel %vm150_vm1, %v600_v16, %v599_v15  ;;  %v4098_v34 = vld [vmem:[%s4621_s3] ss:$0 sm:$0xff]  ;;  %v4112_v48 = vld [vmem:[#allocation6 + $0x8] sm:$0xff]  ;;  %v375_v52 = vrot.slane %v3983_v3, 2  ;;  %s3875_s21 = smov 96   ;;  %v524_v55 = vrot.slane %v3995_v5, 5 }
  0x50   :  { %3253 = vmatprep.subr.mxu0 %v3872_v0  ;;  %3264 = vmatprep.subr.mxu1 %v3872_v0  ;;  %v226_v49 = vsel %vm150_vm1, %v3983_v3, %v225_v47  ;;  %v4119_v50 = vld [vmem:[#allocation6] sm:$0xff]  ;;  %v525_v56 = vrot.slane %v3983_v3, 4  ;;  %v4146_v57 = vld [vmem:[#allocation4 + $0x18] sm:$0xff]  ;;  %v4152_v58 = vld [vmem:[#allocation4 + $0x10] sm:$0xff]  ;;  %v674_v61 = vrot.slane %v3995_v5, 7  ;;  %v675_v62 = vrot.slane %v3983_v3, 6 }
  0x51   :  { %3254 = vmatpush3.msra.mxu0 %v3990_v4  ;;  %3265 = vmatpush3.msra.mxu1 %v3990_v4  ;;  %v376_v54 = vsel %vm150_vm1, %v375_v52, %v374_v51  ;;  %v4159_v60 = vld [vmem:[#allocation4 + $0x8] sm:$0xff]  ;;  %v4172_v63 = vld [vmem:[#allocation4] sm:$0xff]  ;;  %vm3022_vm3 = vcmask 9216  }
  0x52   :  { %3255 = vmatprep.subr.mxu0 %v3872_v0  ;;  %3266 = vmatprep.subr.mxu1 %v3872_v0  ;;  %v526_v59 = vsel %vm150_vm1, %v525_v56, %v524_v55  ;;  %v4203_v9 = vld [vmem:[#allocation9] ss:$0 sm:$0xff] }
  0x53   :  { %3256 = vmatpush3.msra.mxu0 %v4005_v7  ;;  %3267 = vmatpush3.msra.mxu1 %v4005_v7 }
  0x54   :  { %3258 = vmatmul.mubr.msk.f32.vlgmr.msra.gmra.mxu0 %vm152_vm2, %v151_v8  ;;  %3271 = vmatprep.subr.mxu0 %v3872_v0 }
  0x55   :  { %3272 = vmatpush3.msra.mxu0 %v3972_v1  ;;  %3279 = vmatprep.mubr.msk.f32.mxu0 %vm3873_vm0, %v3872_v0 }
  0x56   :  { %3273 = vmatprep.subr.mxu0 %v3872_v0  ;;  %3282 = vmatprep.subr.mxu1 %v3872_v0 }
  0x57   :  { %3274 = vmatpush3.msra.mxu0 %v3977_v2  ;;  %3269 = vmatmul.mubr.msk.f32.vlgmr.msra.gmra.mxu1 %vm152_vm2, %v226_v49 }
  0x58   :  { %3275 = vmatprep.subr.mxu0 %v3872_v0  ;;  %3283 = vmatpush3.msra.mxu1 %v3972_v1 }
  0x59   :  { %3276 = vmatpush3.msra.mxu0 %v3990_v4  ;;  %3284 = vmatprep.subr.mxu1 %v3872_v0 }
  0x5a   :  { %3277 = vmatprep.subr.mxu0 %v3872_v0  ;;  %3285 = vmatpush3.msra.mxu1 %v3977_v2 }
  0x5b   :  { %3278 = vmatpush3.msra.mxu0 %v4005_v7  ;;  %3286 = vmatprep.subr.mxu1 %v3872_v0 }
  0x5c   :  { %3280 = vmatmul.mubr.msk.f32.vlgmr.msra.gmra.mxu0 %vm152_vm2, %v301_v11  ;;  %3293 = vmatprep.subr.mxu0 %v3872_v0 }
  0x5d   :  { %3294 = vmatpush3.msra.mxu0 %v3972_v1  ;;  %3301 = vmatprep.mubr.msk.f32.mxu0 %vm3873_vm0, %v3872_v0 }
  0x5e   :  { %3295 = vmatprep.subr.mxu0 %v3872_v0  ;;  %3287 = vmatpush3.msra.mxu1 %v3990_v4 }
  0x5f   :  { %3296 = vmatpush3.msra.mxu0 %v3977_v2  ;;  %3288 = vmatprep.subr.mxu1 %v3872_v0 }
  0x60   :  { %3297 = vmatprep.subr.mxu0 %v3872_v0  ;;  %3289 = vmatpush3.msra.mxu1 %v4005_v7 }
  0x61   :  { %3298 = vmatpush3.msra.mxu0 %v3990_v4  ;;  %3290 = vmatprep.mubr.msk.f32.mxu1 %vm3873_vm0, %v3872_v0 }
  0x62   :  { %3299 = vmatprep.subr.mxu0 %v3872_v0  ;;  %3291 = vmatmul.mubr.msk.f32.vlgmr.msra.gmra.mxu1 %vm152_vm2, %v376_v54 }
  0x63   :  { %3300 = vmatpush3.msra.mxu0 %v4005_v7  ;;  %3304 = vmatprep.subr.mxu1 %v3872_v0 }
  0x64   :  { %3302 = vmatmul.mubr.msk.f32.vlgmr.msra.gmra.mxu0 %vm152_vm2, %v451_v14  ;;  %3315 = vmatprep.subr.mxu0 %v3872_v0 }
  0x65   :  { %3316 = vmatpush3.msra.mxu0 %v3972_v1  ;;  %3323 = vmatprep.mubr.msk.f32.mxu0 %vm3873_vm0, %v3872_v0 }
  0x66   :  { %3317 = vmatprep.subr.mxu0 %v3872_v0  ;;  %3305 = vmatpush3.msra.mxu1 %v3972_v1 }
  0x67   :  { %3318 = vmatpush3.msra.mxu0 %v3977_v2  ;;  %3312 = vmatprep.mubr.msk.f32.mxu1 %vm3873_vm0, %v3872_v0 }
  0x68   :  { %3319 = vmatprep.subr.mxu0 %v3872_v0  ;;  %3306 = vmatprep.subr.mxu1 %v3872_v0 }
  0x69   :  { %3320 = vmatpush3.msra.mxu0 %v3990_v4  ;;  %3307 = vmatpush3.msra.mxu1 %v3977_v2 }
  0x6a   :  { %3321 = vmatprep.subr.mxu0 %v3872_v0  ;;  %3308 = vmatprep.subr.mxu1 %v3872_v0 }
  0x6b   :  { %3322 = vmatpush3.msra.mxu0 %v4005_v7  ;;  %3309 = vmatpush3.msra.mxu1 %v3990_v4 }
  0x6c   :  { %3324 = vmatmul.mubr.msk.f32.vlgmr.msra.gmra.mxu0 %vm152_vm2, %v601_v17  ;;  %3337 = vmatprep.subr.mxu0 %v3872_v0 }
  0x6d   :  { %3338 = vmatpush3.msra.mxu0 %v4058_v18  ;;  %3345 = vmatprep.mubr.msk.f32.mxu0 %vm3873_vm0, %v3872_v0 }
  0x6e   :  { %3339 = vmatprep.subr.mxu0 %v3872_v0  ;;  %3310 = vmatprep.subr.mxu1 %v3872_v0 }
  0x6f   :  { %3340 = vmatpush3.msra.mxu0 %v4063_v19  ;;  %3311 = vmatpush3.msra.mxu1 %v4005_v7 }
  0x70   :  { %3341 = vmatprep.subr.mxu0 %v3872_v0  ;;  %3313 = vmatmul.mubr.msk.f32.vlgmr.msra.gmra.mxu1 %vm152_vm2, %v526_v59 }
  0x71   :  { %3342 = vmatpush3.msra.mxu0 %v4069_v20  ;;  %3326 = vmatprep.subr.mxu1 %v3872_v0 }
  0x72   :  { %3343 = vmatprep.subr.mxu0 %v3872_v0  ;;  %3327 = vmatpush3.msra.mxu1 %v3972_v1  ;;  %v676_v1 = vsel %vm150_vm1, %v675_v62, %v674_v61 }
  0x73   :  { %3344 = vmatpush3.msra.mxu0 %v4073_v21  ;;  %3334 = vmatprep.mubr.msk.f32.mxu1 %vm3873_vm0, %v3872_v0 }
  0x74   :  { %3346 = vmatmul.mubr.f32.vlgmr.msra.gmra.mxu0 %v3872_v0  ;;  %3359 = vmatprep.subr.mxu0 %v3872_v0 }
  0x75   :  { %3367 = vmatprep.mubr.msk.f32.mxu0 %vm3873_vm0, %v3872_v0  ;;  %3360 = vmatpush3.msra.mxu0 %v4105_v45 }
  0x76   :  { %3361 = vmatprep.subr.mxu0 %v3872_v0  ;;  %3328 = vmatprep.subr.mxu1 %v3872_v0 }
  0x77   :  { %3362 = vmatpush3.msra.mxu0 %v4107_v46  ;;  %3329 = vmatpush3.msra.mxu1 %v3977_v2 }
  0x78   :  { %3363 = vmatprep.subr.mxu0 %v3872_v0  ;;  %3330 = vmatprep.subr.mxu1 %v3872_v0 }
  0x79   :  { %3364 = vmatpush3.msra.mxu0 %v4112_v48  ;;  %3331 = vmatpush3.msra.mxu1 %v3990_v4 }
  0x7a   :  { %3365 = vmatprep.subr.mxu0 %v3872_v0  ;;  %3332 = vmatprep.subr.mxu1 %v3872_v0 }
  0x7b   :  { %3366 = vmatpush3.msra.mxu0 %v4119_v50  ;;  %3333 = vmatpush3.msra.mxu1 %v4005_v7 }
  0x7c   :  { %3368 = vmatmul.mubr.f32.vlgmr.msra.gmra.mxu0 %v3872_v0  ;;  %3381 = vmatprep.subr.mxu0 %v3872_v0 }
  0x7d   :  { %3382 = vmatpush3.msra.mxu0 %v4146_v57  ;;  %3389 = vmatprep.mubr.msk.f32.mxu0 %vm3873_vm0, %v3872_v0 }
  0x7e   :  { %3383 = vmatprep.subr.mxu0 %v3872_v0  ;;  %3335 = vmatmul.mubr.msk.f32.vlgmr.msra.gmra.mxu1 %vm152_vm2, %v676_v1 }
  0x7f   :  { %3384 = vmatpush3.msra.mxu0 %v4152_v58  ;;  %3348 = vmatprep.subr.mxu1 %v3872_v0 }
  0x80   :  { %3385 = vmatprep.subr.mxu0 %v3872_v0  ;;  %3349 = vmatpush3.msra.mxu1 %v4146_v57 }
  0x81   :  { %3386 = vmatpush3.msra.mxu0 %v4159_v60  ;;  %3356 = vmatprep.mubr.msk.f32.mxu1 %vm3873_vm0, %v3872_v0 }
  0x82   :  { %3387 = vmatprep.subr.mxu0 %v3872_v0  ;;  %3350 = vmatprep.subr.mxu1 %v3872_v0 }
  0x83   :  { %3388 = vmatpush3.msra.mxu0 %v4172_v63  ;;  %3351 = vmatpush3.msra.mxu1 %v4152_v58 }
  0x84   :  { %3403 = vmatprep.subr.mxu0 %v3872_v0  ;;  %3352 = vmatprep.subr.mxu1 %v3872_v0 }
  0x85   :  { %3353 = vmatpush3.msra.mxu1 %v4159_v60 }
  0x86   :  { %3354 = vmatprep.subr.mxu1 %v3872_v0 }
  0x87   :  { %3355 = vmatpush3.msra.mxu1 %v4172_v63 }
  0x88   :  { %3370 = vmatprep.subr.mxu1 %v3872_v0 }
 0x114   :  { %v221_v22 = vpop.f32.mrf.mxu0 }
 0x115   :  { %v222_v35 = vadd.f32 %v4098_v34, %v221_v22 }
 0x116   :  { %v3259_v23 = vpop.f32.mrf.mxu0 }
 0x117   :  { %v295_v7 = vpop.f32.mrf.mxu1 }
 0x119   :  { %v3270_v8 = vpop.f32.mrf.mxu1 }
 0x11c   :  { %v4082_v24 = vpop.f32.mrf.mxu0 }
 0x11e   :  { %v3281_v25 = vpop.f32.mrf.mxu0 }
 0x11f   :  { %v4235_v25 = vld [vmem:[#allocation7] ss:$0 sm:$0xff] }
 0x122   :  { %v4207_v13 = vpop.f32.mrf.mxu1 }
 0x124   :  { %v4084_v26 = vpop.f32.mrf.mxu0  ;;  %v3292_v14 = vpop.f32.mrf.mxu1 }
 0x126   :  { %v3303_v27 = vpop.f32.mrf.mxu0 }
 0x12c   :  { %v4086_v28 = vpop.f32.mrf.mxu0 }
 0x12e   :  { %v3325_v29 = vpop.f32.mrf.mxu0 }
 0x130   :  { %v4209_v15 = vpop.f32.mrf.mxu1 }
 0x132   :  { %v3314_v16 = vpop.f32.mrf.mxu1 }
 0x134   :  { %v824_v31 = vpop.f32.mrf.mxu0 }
 0x135   :  { %v825_v32 = vadd.f32 %v4091_v30, %v824_v31 }
 0x136   :  { %v3347_v33 = vpop.f32.mrf.mxu0 }
 0x137   :  { %836 = vrot.lane.b32.xlu0 %v825_v32, %s3874_s18  ;;  %v828_v36 = vadd.f32 %v825_v32, %v222_v35 }
 0x139   :  { %v3042_v37 = vmul.f32 -1.442695, %v828_v36 }
 0x13b   :  { %3624 = vpow2.f32 %v3042_v37 }
 0x13c   :  { %v1007_v10 = vpop.f32.mrf.mxu0 }
 0x13d   :  { %v1008_v11 = vadd.f32 %v4203_v9, %v1007_v10 }
 0x13e   :  { %v3369_v12 = vpop.f32.mrf.mxu0  ;;  %v4211_v17 = vpop.f32.mrf.mxu1 }
 0x140   :  { %v3336_v22 = vpop.f32.mrf.mxu1 }
 0x148   :  { %v3625_v38 = vpop.eup %3624 }
 0x149   :  { %v832_v39 = vadd.f32 1.0, %v3625_v38 }
 0x14b   :  { %3626 = vrcp.f32 %v832_v39 }
 0x158   :  { %v4101_v40 = vpop.eup %3626 }
 0x159   :  { %v846_v2 = vsub.f32 1.0, %v4101_v40  ;;  %v852_v4 = vmul.f32 0.0, %v4101_v40 }
 0x1a9   :  { %v837_v41 = vpop.permute.xlu0 %836 }
 0x1aa   :  { %v839_v42 = vmul.f32 %v4101_v40, %v837_v41 }
 0x1ac   :  { %841 = vrot.lane.b32.xlu0 %v839_v42, %s3874_s18 }
 0x21e   :  { %v842_v43 = vpop.permute.xlu0 %841 }
 0x21f   :  { %v844_v44 = vadd.f32 %v842_v43, %v222_v35  ;;  %v296_v43 = vadd.f32 %v4098_v34, %v295_v7 }
 0x221   :  { %3628 = vtanh.f32 %v844_v44 }
 0x22e   :  { %v3629_v53 = vpop.eup %3628 }
 0x22f   :  { %848 = vrot.lane.b32.xlu1 %v3629_v53, %s3875_s21 }
 0x2a1   :  { %v849_v3 = vpop.permute.xlu1 %848 }
 0x2a2   :  { %v851_v5 = vmul.f32 %v849_v3, %v846_v2 }
 0x2a4   :  { %v4199_v6 = vadd.f32 %v852_v4, %v851_v5 }
 0x2a6   :  { %861 = vrot.lane.b32.xlu1 %v4199_v6, %s3875_s21 }
 0x2aa   :  { %1019 = vrot.lane.b32.xlu1 %v1008_v11, %s3874_s18 }
 0x318   :  { %v862_v23 = vpop.permute.xlu1 %861 }
 0x319   :  { %3357 = vmatmul.mubr.msk.f32.vlgmr.msra.gmra.mxu1 %vm152_vm2, %v862_v23 }
 0x31a   :  { %3371 = vmatpush3.msra.mxu1 %v4058_v18  ;;  %3378 = vmatprep.mubr.msk.f32.mxu1 %vm3873_vm0, %v3872_v0 }
 0x31b   :  { %3372 = vmatprep.subr.mxu1 %v3872_v0 }
 0x31c   :  { %3373 = vmatpush3.msra.mxu1 %v4063_v19  ;;  %v1020_v40 = vpop.permute.xlu1 %1019 }
 0x31d   :  { %3374 = vmatprep.subr.mxu1 %v3872_v0 }
 0x31e   :  { %3375 = vmatpush3.msra.mxu1 %v4069_v20 }
 0x31f   :  { %3376 = vmatprep.subr.mxu1 %v3872_v0 }
 0x320   :  { %3377 = vmatpush3.msra.mxu1 %v4073_v21 }
 0x321   :  { %3379 = vmatmul.mubr.msk.f32.vlgmr.msra.gmra.mxu1 %vm152_vm2, %v862_v23  ;;  %3392 = vmatprep.subr.mxu1 %v3872_v0 }
 0x322   :  { %3393 = vmatpush3.msra.mxu1 %v4105_v45  ;;  %3400 = vmatprep.mubr.msk.f32.mxu1 %vm3873_vm0, %v3872_v0 }
 0x323   :  { %3394 = vmatprep.subr.mxu1 %v3872_v0 }
 0x324   :  { %3395 = vmatpush3.msra.mxu1 %v4107_v46 }
 0x325   :  { %3396 = vmatprep.subr.mxu1 %v3872_v0 }
 0x326   :  { %3397 = vmatpush3.msra.mxu1 %v4112_v48 }
 0x327   :  { %3398 = vmatprep.subr.mxu1 %v3872_v0 }
 0x328   :  { %3399 = vmatpush3.msra.mxu1 %v4119_v50 }
 0x329   :  { %3414 = vmatprep.subr.mxu1 %v3872_v0 }
 0x3d9   :  { %v931_v27 = vpop.f32.mrf.mxu1 }
 0x3da   :  { %v932_v29 = vadd.f32 %v4235_v25, %v931_v27 }
 0x3db   :  { %v3358_v31 = vpop.f32.mrf.mxu1 }
 0x3dc   :  { %v1011_v32 = vadd.f32 %v1008_v11, %v932_v29 }
 0x3de   :  { %v3046_v33 = vmul.f32 -1.442695, %v1011_v32 }
 0x3e0   :  { %3630 = vpow2.f32 %v3046_v33 }
 0x3e1   :  { %v1103_v35 = vpop.f32.mrf.mxu1 }
 0x3e2   :  { %v1104_v36 = vadd.f32 %v4091_v30, %v1103_v35 }
 0x3e3   :  { %v3380_v37 = vpop.f32.mrf.mxu1 }
 0x3e4   :  { %1115 = vrot.lane.b32.xlu0 %v1104_v36, %s3874_s18  ;;  %v1107_v44 = vadd.f32 %v1104_v36, %v296_v43 }
 0x3e6   :  { %v3048_v47 = vmul.f32 -1.442695, %v1107_v44  ;;  %v371_v44 = vadd.f32 %v4098_v34, %v4082_v24 }
 0x3ed   :  { %v3631_v38 = vpop.eup %3630 }
 0x3ee   :  { %v1015_v39 = vadd.f32 1.0, %v3631_v38 }
 0x3f0   :  { %3632 = vrcp.f32 %v1015_v39 }
 0x3f1   :  { %3634 = vpow2.f32 %v3048_v47 }
 0x3fd   :  { %v3633_v41 = vpop.eup %3632 }
 0x3fe   :  { %v1022_v42 = vmul.f32 %v3633_v41, %v1020_v40  ;;  %v3635_v49 = vpop.eup %3634  ;;  %v1029_v2 = vsub.f32 1.0, %v3633_v41  ;;  %v1035_v4 = vmul.f32 0.0, %v3633_v41 }
 0x3ff   :  { %v1111_v51 = vadd.f32 1.0, %v3635_v49 }
 0x400   :  { %1024 = vrot.lane.b32.xlu1 %v1022_v42, %s3874_s18 }
 0x401   :  { %3636 = vrcp.f32 %v1111_v51 }
 0x40e   :  { %v3637_v52 = vpop.eup %3636 }
 0x40f   :  { %v1125_v8 = vsub.f32 1.0, %v3637_v52  ;;  %v1131_v11 = vmul.f32 %v3637_v52, %v4199_v6 }
 0x456   :  { %v1116_v53 = vpop.permute.xlu0 %1115 }
 0x457   :  { %v1118_v54 = vmul.f32 %v3637_v52, %v1116_v53 }
 0x459   :  { %1120 = vrot.lane.b32.xlu0 %v1118_v54, %s3874_s18 }
 0x472   :  { %v1025_v55 = vpop.permute.xlu1 %1024 }
 0x473   :  { %v1027_v56 = vadd.f32 %v1025_v55, %v932_v29 }
 0x475   :  { %3638 = vtanh.f32 %v1027_v56 }
 0x482   :  { %v3639_v59 = vpop.eup %3638 }
 0x483   :  { %1031 = vrot.lane.b32.xlu1 %v3639_v59, %s3875_s21 }
 0x4cb   :  { %v1121_v61 = vpop.permute.xlu0 %1120 }
 0x4cc   :  { %v1123_v62 = vadd.f32 %v1121_v61, %v296_v43 }
 0x4ce   :  { %3640 = vtanh.f32 %v1123_v62 }
 0x4db   :  { %v3641_v1 = vpop.eup %3640 }
 0x4dc   :  { %1127 = vrot.lane.b32.xlu0 %v3641_v1, %s3875_s21 }
 0x4f5   :  { %v1032_v3 = vpop.permute.xlu1 %1031 }
 0x4f6   :  { %v1034_v5 = vmul.f32 %v1032_v3, %v1029_v2 }
 0x4f8   :  { %v4245_v7 = vadd.f32 %v1035_v4, %v1034_v5 }
 0x4fa   :  { %1209 = vrot.lane.b32.xlu1 %v4245_v7, %s3875_s21 }
 0x54e   :  { %v1128_v10 = vpop.permute.xlu0 %1127 }
 0x54f   :  { %v1130_v12 = vmul.f32 %v1128_v10, %v1125_v8 }
 0x551   :  { %v4250_v14 = vadd.f32 %v1131_v11, %v1130_v12 }
 0x553   :  { %1134 = vrot.lane.b32.xlu0 %v4250_v14, %s3875_s21 }
 0x56c   :  { %v1210_v16 = vpop.permute.xlu1 %1209 }
 0x56d   :  { %3401 = vmatmul.mubr.msk.f32.vlgmr.msra.gmra.mxu1 %vm152_vm2, %v1210_v16 }
 0x56e   :  { %3415 = vmatpush3.msra.mxu1 %v4146_v57  ;;  %3422 = vmatprep.mubr.msk.f32.mxu1 %vm3873_vm0, %v3872_v0 }
 0x56f   :  { %3416 = vmatprep.subr.mxu1 %v3872_v0 }
 0x570   :  { %3417 = vmatpush3.msra.mxu1 %v4152_v58 }
 0x571   :  { %3418 = vmatprep.subr.mxu1 %v3872_v0 }
 0x572   :  { %3419 = vmatpush3.msra.mxu1 %v4159_v60 }
 0x573   :  { %3420 = vmatprep.subr.mxu1 %v3872_v0 }
 0x574   :  { %3421 = vmatpush3.msra.mxu1 %v4172_v63 }
 0x575   :  { %3436 = vmatprep.subr.mxu1 %v3872_v0 }
 0x5c5   :  { %v1135_v6 = vpop.permute.xlu0 %1134 }
 0x5c6   :  { %3390 = vmatmul.mubr.msk.f32.vlgmr.msra.gmra.mxu0 %vm152_vm2, %v1135_v6 }
 0x5c7   :  { %3404 = vmatpush3.msra.mxu0 %v4058_v18  ;;  %3411 = vmatprep.mubr.msk.f32.mxu0 %vm3873_vm0, %v3872_v0 }
 0x5c8   :  { %3405 = vmatprep.subr.mxu0 %v3872_v0 }
 0x5c9   :  { %3406 = vmatpush3.msra.mxu0 %v4063_v19 }
 0x5ca   :  { %3407 = vmatprep.subr.mxu0 %v3872_v0 }
 0x5cb   :  { %3408 = vmatpush3.msra.mxu0 %v4069_v20 }
 0x5cc   :  { %3409 = vmatprep.subr.mxu0 %v3872_v0 }
 0x5cd   :  { %3410 = vmatpush3.msra.mxu0 %v4073_v21 }
 0x5ce   :  { %3412 = vmatmul.mubr.msk.f32.vlgmr.msra.gmra.mxu0 %vm152_vm2, %v1135_v6  ;;  %3425 = vmatprep.subr.mxu0 %v3872_v0 }
 0x5cf   :  { %3426 = vmatpush3.msra.mxu0 %v4105_v45  ;;  %3433 = vmatprep.mubr.msk.f32.mxu0 %vm3873_vm0, %v3872_v0 }
 0x5d0   :  { %3427 = vmatprep.subr.mxu0 %v3872_v0 }
 0x5d1   :  { %3428 = vmatpush3.msra.mxu0 %v4107_v46 }
 0x5d2   :  { %3429 = vmatprep.subr.mxu0 %v3872_v0 }
 0x5d3   :  { %3430 = vmatpush3.msra.mxu0 %v4112_v48 }
 0x5d4   :  { %3431 = vmatprep.subr.mxu0 %v3872_v0 }
 0x5d5   :  { %3432 = vmatpush3.msra.mxu0 %v4119_v50 }
 0x5d6   :  { %3447 = vmatprep.subr.mxu0 %v3872_v0 }
 0x62d   :  { %v1279_v22 = vpop.f32.mrf.mxu1 }
 0x62e   :  { %v1280_v23 = vadd.f32 %v4203_v9, %v1279_v22 }
 0x62f   :  { %v3402_v27 = vpop.f32.mrf.mxu1 }
 0x630   :  { %1291 = vrot.lane.b32.xlu1 %v1280_v23, %s3874_s18 }
 0x686   :  { %v1204_v29 = vpop.f32.mrf.mxu0 }
 0x687   :  { %v1205_v31 = vadd.f32 %v4235_v25, %v1204_v29 }
 0x688   :  { %v3391_v32 = vpop.f32.mrf.mxu0 }
 0x689   :  { %v1283_v33 = vadd.f32 %v1280_v23, %v1205_v31 }
 0x68b   :  { %v3051_v35 = vmul.f32 -1.442695, %v1283_v33 }
 0x68d   :  { %3642 = vpow2.f32 %v3051_v35 }
 0x68e   :  { %v1375_v36 = vpop.f32.mrf.mxu0 }
 0x68f   :  { %v1376_v37 = vadd.f32 %v4091_v30, %v1375_v36 }
 0x690   :  { %v3413_v38 = vpop.f32.mrf.mxu0 }
 0x691   :  { %1387 = vrot.lane.b32.xlu0 %v1376_v37, %s3874_s18  ;;  %v1379_v47 = vadd.f32 %v1376_v37, %v371_v44 }
 0x693   :  { %v3053_v49 = vmul.f32 -1.442695, %v1379_v47 }
 0x69a   :  { %v3643_v39 = vpop.eup %3642 }
 0x69b   :  { %v1287_v40 = vadd.f32 1.0, %v3643_v39 }
 0x69d   :  { %3644 = vrcp.f32 %v1287_v40 }
 0x69e   :  { %3646 = vpow2.f32 %v3053_v49 }
 0x6a2   :  { %v1292_v42 = vpop.permute.xlu1 %1291 }
 0x6aa   :  { %v3645_v41 = vpop.eup %3644 }
 0x6ab   :  { %v1294_v43 = vmul.f32 %v3645_v41, %v1292_v42  ;;  %v3647_v51 = vpop.eup %3646  ;;  %v1301_v2 = vsub.f32 1.0, %v3645_v41  ;;  %v1307_v4 = vmul.f32 %v3645_v41, %v4245_v7 }
 0x6ac   :  { %v1383_v52 = vadd.f32 1.0, %v3647_v51 }
 0x6ad   :  { %1296 = vrot.lane.b32.xlu1 %v1294_v43, %s3874_s18 }
 0x6ae   :  { %3648 = vrcp.f32 %v1383_v52 }
 0x6bb   :  { %v3649_v53 = vpop.eup %3648 }
 0x6bc   :  { %v1397_v10 = vsub.f32 1.0, %v3649_v53  ;;  %v1403_v12 = vmul.f32 %v3649_v53, %v4250_v14 }
 0x703   :  { %v1388_v54 = vpop.permute.xlu0 %1387 }
 0x704   :  { %v1390_v55 = vmul.f32 %v3649_v53, %v1388_v54 }
 0x706   :  { %1392 = vrot.lane.b32.xlu0 %v1390_v55, %s3874_s18 }
 0x71f   :  { %v1297_v56 = vpop.permute.xlu1 %1296 }
 0x720   :  { %v1299_v59 = vadd.f32 %v1297_v56, %v1205_v31 }
 0x722   :  { %3650 = vtanh.f32 %v1299_v59 }
 0x72f   :  { %v3651_v61 = vpop.eup %3650 }
 0x730   :  { %1303 = vrot.lane.b32.xlu1 %v3651_v61, %s3875_s21 }
 0x778   :  { %v1393_v62 = vpop.permute.xlu0 %1392 }
 0x779   :  { %v1395_v1 = vadd.f32 %v1393_v62, %v371_v44  ;;  %v446_v44 = vadd.f32 %v4098_v34, %v4207_v13 }
 0x77b   :  { %3652 = vtanh.f32 %v1395_v1 }
 0x788   :  { %v3653_v24 = vpop.eup %3652 }
 0x789   :  { %1399 = vrot.lane.b32.xlu0 %v3653_v24, %s3875_s21 }
 0x7a2   :  { %v1304_v3 = vpop.permute.xlu1 %1303 }
 0x7a3   :  { %v1306_v5 = vmul.f32 %v1304_v3, %v1301_v2 }
 0x7a5   :  { %v4299_v8 = vadd.f32 %v1307_v4, %v1306_v5 }
 0x7a7   :  { %1481 = vrot.lane.b32.xlu1 %v4299_v8, %s3875_s21 }
 0x7fb   :  { %v1400_v11 = vpop.permute.xlu0 %1399 }
 0x7fc   :  { %v1402_v16 = vmul.f32 %v1400_v11, %v1397_v10 }
 0x7fe   :  { %v4304_v6 = vadd.f32 %v1403_v12, %v1402_v16 }
 0x800   :  { %1406 = vrot.lane.b32.xlu0 %v4304_v6, %s3875_s21 }
 0x819   :  { %v1482_v22 = vpop.permute.xlu1 %1481 }
 0x81a   :  { %3434 = vmatmul.mubr.msk.f32.vlgmr.msra.gmra.mxu0 %vm152_vm2, %v1482_v22 }
 0x81b   :  { %3448 = vmatpush3.msra.mxu0 %v4146_v57  ;;  %3455 = vmatprep.mubr.msk.f32.mxu0 %vm3873_vm0, %v3872_v0 }
 0x81c   :  { %3449 = vmatprep.subr.mxu0 %v3872_v0 }
 0x81d   :  { %3450 = vmatpush3.msra.mxu0 %v4152_v58 }
 0x81e   :  { %3451 = vmatprep.subr.mxu0 %v3872_v0 }
 0x81f   :  { %3452 = vmatpush3.msra.mxu0 %v4159_v60 }
 0x820   :  { %3453 = vmatprep.subr.mxu0 %v3872_v0 }
 0x821   :  { %3454 = vmatpush3.msra.mxu0 %v4172_v63 }
 0x822   :  { %3469 = vmatprep.subr.mxu0 %v3872_v0 }
 0x872   :  { %v1407_v7 = vpop.permute.xlu0 %1406 }
 0x873   :  { %3423 = vmatmul.mubr.msk.f32.vlgmr.msra.gmra.mxu1 %vm152_vm2, %v1407_v7 }
 0x874   :  { %3437 = vmatpush3.msra.mxu1 %v4058_v18  ;;  %3444 = vmatprep.mubr.msk.f32.mxu1 %vm3873_vm0, %v3872_v0 }
 0x875   :  { %3438 = vmatprep.subr.mxu1 %v3872_v0 }
 0x876   :  { %3439 = vmatpush3.msra.mxu1 %v4063_v19 }
 0x877   :  { %3440 = vmatprep.subr.mxu1 %v3872_v0 }
 0x878   :  { %3441 = vmatpush3.msra.mxu1 %v4069_v20 }
 0x879   :  { %3442 = vmatprep.subr.mxu1 %v3872_v0 }
 0x87a   :  { %3443 = vmatpush3.msra.mxu1 %v4073_v21 }
 0x87b   :  { %3445 = vmatmul.mubr.msk.f32.vlgmr.msra.gmra.mxu1 %vm152_vm2, %v1407_v7  ;;  %3458 = vmatprep.subr.mxu1 %v3872_v0 }
 0x87c   :  { %3459 = vmatpush3.msra.mxu1 %v4105_v45  ;;  %3466 = vmatprep.mubr.msk.f32.mxu1 %vm3873_vm0, %v3872_v0 }
 0x87d   :  { %3460 = vmatprep.subr.mxu1 %v3872_v0 }
 0x87e   :  { %3461 = vmatpush3.msra.mxu1 %v4107_v46 }
 0x87f   :  { %3462 = vmatprep.subr.mxu1 %v3872_v0 }
 0x880   :  { %3463 = vmatpush3.msra.mxu1 %v4112_v48 }
 0x881   :  { %3464 = vmatprep.subr.mxu1 %v3872_v0 }
 0x882   :  { %3465 = vmatpush3.msra.mxu1 %v4119_v50 }
 0x883   :  { %3480 = vmatprep.subr.mxu1 %v3872_v0 }
 0x8da   :  { %v1551_v14 = vpop.f32.mrf.mxu0 }
 0x8db   :  { %v1552_v23 = vadd.f32 %v4203_v9, %v1551_v14 }
 0x8dc   :  { %v3435_v27 = vpop.f32.mrf.mxu0 }
 0x8dd   :  { %1563 = vrot.lane.b32.xlu1 %v1552_v23, %s3874_s18 }
 0x933   :  { %v1476_v29 = vpop.f32.mrf.mxu1 }
 0x934   :  { %v1477_v31 = vadd.f32 %v4235_v25, %v1476_v29 }
 0x935   :  { %v3424_v32 = vpop.f32.mrf.mxu1 }
 0x936   :  { %v1555_v33 = vadd.f32 %v1552_v23, %v1477_v31 }
 0x938   :  { %v3056_v35 = vmul.f32 -1.442695, %v1555_v33 }
 0x93a   :  { %3654 = vpow2.f32 %v3056_v35 }
 0x93b   :  { %v1647_v36 = vpop.f32.mrf.mxu1 }
 0x93c   :  { %v1648_v37 = vadd.f32 %v4091_v30, %v1647_v36 }
 0x93d   :  { %v3446_v38 = vpop.f32.mrf.mxu1 }
 0x93e   :  { %1659 = vrot.lane.b32.xlu0 %v1648_v37, %s3874_s18  ;;  %v1651_v47 = vadd.f32 %v1648_v37, %v446_v44 }
 0x940   :  { %v3058_v49 = vmul.f32 -1.442695, %v1651_v47 }
 0x947   :  { %v3655_v39 = vpop.eup %3654 }
 0x948   :  { %v1559_v40 = vadd.f32 1.0, %v3655_v39 }
 0x94a   :  { %3656 = vrcp.f32 %v1559_v40 }
 0x94b   :  { %3658 = vpow2.f32 %v3058_v49 }
 0x94f   :  { %v1564_v42 = vpop.permute.xlu1 %1563 }
 0x957   :  { %v3657_v41 = vpop.eup %3656 }
 0x958   :  { %v1566_v43 = vmul.f32 %v3657_v41, %v1564_v42  ;;  %v3659_v51 = vpop.eup %3658  ;;  %v1573_v24 = vsub.f32 1.0, %v3657_v41  ;;  %v1579_v3 = vmul.f32 %v3657_v41, %v4299_v8 }
 0x959   :  { %v1655_v52 = vadd.f32 1.0, %v3659_v51 }
 0x95a   :  { %1568 = vrot.lane.b32.xlu1 %v1566_v43, %s3874_s18  ;;  %v521_v43 = vadd.f32 %v4098_v34, %v4084_v26 }
 0x95b   :  { %3660 = vrcp.f32 %v1655_v52 }
 0x968   :  { %v3661_v53 = vpop.eup %3660 }
 0x969   :  { %v1669_v10 = vsub.f32 1.0, %v3661_v53  ;;  %v1675_v12 = vmul.f32 %v3661_v53, %v4304_v6 }
 0x9b0   :  { %v1660_v54 = vpop.permute.xlu0 %1659 }
 0x9b1   :  { %v1662_v55 = vmul.f32 %v3661_v53, %v1660_v54 }
 0x9b3   :  { %1664 = vrot.lane.b32.xlu0 %v1662_v55, %s3874_s18 }
 0x9cc   :  { %v1569_v56 = vpop.permute.xlu1 %1568 }
 0x9cd   :  { %v1571_v59 = vadd.f32 %v1569_v56, %v1477_v31 }
 0x9cf   :  { %3662 = vtanh.f32 %v1571_v59 }
 0x9dc   :  { %v3663_v61 = vpop.eup %3662 }
 0x9dd   :  { %1575 = vrot.lane.b32.xlu1 %v3663_v61, %s3875_s21 }
 0xa25   :  { %v1665_v62 = vpop.permute.xlu0 %1664 }
 0xa26   :  { %v1667_v1 = vadd.f32 %v1665_v62, %v446_v44 }
 0xa28   :  { %3664 = vtanh.f32 %v1667_v1 }
 0xa35   :  { %v3665_v13 = vpop.eup %3664 }
 0xa36   :  { %1671 = vrot.lane.b32.xlu0 %v3665_v13, %s3875_s21 }
 0xa4f   :  { %v1576_v2 = vpop.permute.xlu1 %1575 }
 0xa50   :  { %v1578_v4 = vmul.f32 %v1576_v2, %v1573_v24 }
 0xa52   :  { %v4353_v5 = vadd.f32 %v1579_v3, %v1578_v4 }
 0xa54   :  { %1753 = vrot.lane.b32.xlu1 %v4353_v5, %s3875_s21 }
 0xaa8   :  { %v1672_v11 = vpop.permute.xlu0 %1671 }
 0xaa9   :  { %v1674_v16 = vmul.f32 %v1672_v11, %v1669_v10 }
 0xaab   :  { %v4358_v22 = vadd.f32 %v1675_v12, %v1674_v16 }
 0xaad   :  { %1678 = vrot.lane.b32.xlu0 %v4358_v22, %s3875_s21 }
 0xac6   :  { %v1754_v7 = vpop.permute.xlu1 %1753 }
 0xac7   :  { %3467 = vmatmul.mubr.msk.f32.vlgmr.msra.gmra.mxu1 %vm152_vm2, %v1754_v7 }
 0xac8   :  { %3481 = vmatpush3.msra.mxu1 %v4146_v57  ;;  %3488 = vmatprep.mubr.msk.f32.mxu1 %vm3873_vm0, %v3872_v0 }
 0xac9   :  { %3482 = vmatprep.subr.mxu1 %v3872_v0 }
 0xaca   :  { %3483 = vmatpush3.msra.mxu1 %v4152_v58 }
 0xacb   :  { %3484 = vmatprep.subr.mxu1 %v3872_v0 }
 0xacc   :  { %3485 = vmatpush3.msra.mxu1 %v4159_v60 }
 0xacd   :  { %3486 = vmatprep.subr.mxu1 %v3872_v0 }
 0xace   :  { %3487 = vmatpush3.msra.mxu1 %v4172_v63 }
 0xacf   :  { %3502 = vmatprep.subr.mxu1 %v3872_v0 }
 0xb1f   :  { %v1679_v8 = vpop.permute.xlu0 %1678 }
 0xb20   :  { %3456 = vmatmul.mubr.msk.f32.vlgmr.msra.gmra.mxu0 %vm152_vm2, %v1679_v8 }
 0xb21   :  { %3470 = vmatpush3.msra.mxu0 %v4058_v18  ;;  %3477 = vmatprep.mubr.msk.f32.mxu0 %vm3873_vm0, %v3872_v0 }
 0xb22   :  { %3471 = vmatprep.subr.mxu0 %v3872_v0 }
 0xb23   :  { %3472 = vmatpush3.msra.mxu0 %v4063_v19 }
 0xb24   :  { %3473 = vmatprep.subr.mxu0 %v3872_v0 }
 0xb25   :  { %3474 = vmatpush3.msra.mxu0 %v4069_v20 }
 0xb26   :  { %3475 = vmatprep.subr.mxu0 %v3872_v0 }
 0xb27   :  { %3476 = vmatpush3.msra.mxu0 %v4073_v21 }
 0xb28   :  { %3478 = vmatmul.mubr.msk.f32.vlgmr.msra.gmra.mxu0 %vm152_vm2, %v1679_v8  ;;  %3491 = vmatprep.subr.mxu0 %v3872_v0 }
 0xb29   :  { %3492 = vmatpush3.msra.mxu0 %v4105_v45  ;;  %3499 = vmatprep.mubr.msk.f32.mxu0 %vm3873_vm0, %v3872_v0 }
 0xb2a   :  { %3493 = vmatprep.subr.mxu0 %v3872_v0 }
 0xb2b   :  { %3494 = vmatpush3.msra.mxu0 %v4107_v46 }
 0xb2c   :  { %3495 = vmatprep.subr.mxu0 %v3872_v0 }
 0xb2d   :  { %3496 = vmatpush3.msra.mxu0 %v4112_v48 }
 0xb2e   :  { %3497 = vmatprep.subr.mxu0 %v3872_v0 }
 0xb2f   :  { %3498 = vmatpush3.msra.mxu0 %v4119_v50 }
 0xb30   :  { %3513 = vmatprep.subr.mxu0 %v3872_v0 }
 0xb87   :  { %v1823_v6 = vpop.f32.mrf.mxu1 }
 0xb88   :  { %v1824_v14 = vadd.f32 %v4203_v9, %v1823_v6 }
 0xb89   :  { %v3468_v23 = vpop.f32.mrf.mxu1 }
 0xb8a   :  { %1835 = vrot.lane.b32.xlu0 %v1824_v14, %s3874_s18 }
 0xbe0   :  { %v1748_v27 = vpop.f32.mrf.mxu0 }
 0xbe1   :  { %v1749_v29 = vadd.f32 %v4235_v25, %v1748_v27 }
 0xbe2   :  { %v3457_v31 = vpop.f32.mrf.mxu0 }
 0xbe3   :  { %v1827_v32 = vadd.f32 %v1824_v14, %v1749_v29 }
 0xbe5   :  { %v3061_v33 = vmul.f32 -1.442695, %v1827_v32  ;;  %v596_v32 = vadd.f32 %v4098_v34, %v4209_v15 }
 0xbe7   :  { %3666 = vpow2.f32 %v3061_v33 }
 0xbe8   :  { %v1919_v35 = vpop.f32.mrf.mxu0 }
 0xbe9   :  { %v1920_v36 = vadd.f32 %v4091_v30, %v1919_v35 }
 0xbea   :  { %v3479_v37 = vpop.f32.mrf.mxu0 }
 0xbeb   :  { %1931 = vrot.lane.b32.xlu1 %v1920_v36, %s3874_s18  ;;  %v1923_v44 = vadd.f32 %v1920_v36, %v521_v43 }
 0xbed   :  { %v3063_v47 = vmul.f32 -1.442695, %v1923_v44 }
 0xbf4   :  { %v3667_v38 = vpop.eup %3666 }
 0xbf5   :  { %v1831_v39 = vadd.f32 1.0, %v3667_v38 }
 0xbf7   :  { %3668 = vrcp.f32 %v1831_v39 }
 0xbf8   :  { %3670 = vpow2.f32 %v3063_v47 }
 0xbfc   :  { %v1836_v41 = vpop.permute.xlu0 %1835 }
 0xc04   :  { %v3669_v40 = vpop.eup %3668 }
 0xc05   :  { %v1838_v42 = vmul.f32 %v3669_v40, %v1836_v41  ;;  %v3671_v49 = vpop.eup %3670  ;;  %v1845_v1 = vsub.f32 1.0, %v3669_v40  ;;  %v1851_v24 = vmul.f32 %v3669_v40, %v4353_v5 }
 0xc06   :  { %v1927_v51 = vadd.f32 1.0, %v3671_v49 }
 0xc07   :  { %1840 = vrot.lane.b32.xlu0 %v1838_v42, %s3874_s18 }
 0xc08   :  { %3672 = vrcp.f32 %v1927_v51 }
 0xc15   :  { %v3673_v52 = vpop.eup %3672 }
 0xc16   :  { %v1941_v4 = vsub.f32 1.0, %v3673_v52  ;;  %v1947_v11 = vmul.f32 %v3673_v52, %v4358_v22 }
 0xc5d   :  { %v1932_v53 = vpop.permute.xlu1 %1931 }
 0xc5e   :  { %v1934_v54 = vmul.f32 %v3673_v52, %v1932_v53 }
 0xc60   :  { %1936 = vrot.lane.b32.xlu1 %v1934_v54, %s3874_s18 }
 0xc79   :  { %v1841_v55 = vpop.permute.xlu0 %1840 }
 0xc7a   :  { %v1843_v56 = vadd.f32 %v1841_v55, %v1749_v29 }
 0xc7c   :  { %3674 = vtanh.f32 %v1843_v56 }
 0xc89   :  { %v3675_v59 = vpop.eup %3674 }
 0xc8a   :  { %1847 = vrot.lane.b32.xlu0 %v3675_v59, %s3875_s21 }
 0xcd2   :  { %v1937_v61 = vpop.permute.xlu1 %1936 }
 0xcd3   :  { %v1939_v62 = vadd.f32 %v1937_v61, %v521_v43 }
 0xcd5   :  { %3676 = vtanh.f32 %v1939_v62 }
 0xce2   :  { %v3677_v26 = vpop.eup %3676 }
 0xce3   :  { %1943 = vrot.lane.b32.xlu1 %v3677_v26, %s3875_s21  ;;  %v4501_v26 = vld [vmem:[#allocation6 + $0x18] sm:$0xff] }
 0xcfc   :  { %v1848_v13 = vpop.permute.xlu0 %1847 }
 0xcfd   :  { %v1850_v2 = vmul.f32 %v1848_v13, %v1845_v1  ;;  %v4507_v1 = vld [vmem:[#allocation6 + $0x10] sm:$0xff]  ;;  %v4511_v13 = vld [vmem:[#allocation6 + $0x8] sm:$0xff] }
 0xcff   :  { %v4407_v3 = vadd.f32 %v1851_v24, %v1850_v2  ;;  %v4515_v24 = vld [vmem:[#allocation6] sm:$0xff] }
 0xd01   :  { %2025 = vrot.lane.b32.xlu0 %v4407_v3, %s3875_s21 }
 0xd55   :  { %v1944_v10 = vpop.permute.xlu1 %1943 }
 0xd56   :  { %v1946_v12 = vmul.f32 %v1944_v10, %v1941_v4 }
 0xd58   :  { %v4412_v16 = vadd.f32 %v1947_v11, %v1946_v12 }
 0xd5a   :  { %1950 = vrot.lane.b32.xlu1 %v4412_v16, %s3875_s21 }
 0xd73   :  { %v2026_v7 = vpop.permute.xlu0 %2025 }
 0xd74   :  { %3500 = vmatmul.mubr.msk.f32.vlgmr.msra.gmra.mxu0 %vm152_vm2, %v2026_v7 }
 0xd75   :  { %3514 = vmatpush3.msra.mxu0 %v4146_v57  ;;  %3521 = vmatprep.mubr.msk.f32.mxu0 %vm3873_vm0, %v3872_v0 }
 0xd76   :  { %3515 = vmatprep.subr.mxu0 %v3872_v0 }
 0xd77   :  { %3516 = vmatpush3.msra.mxu0 %v4152_v58 }
 0xd78   :  { %3517 = vmatprep.subr.mxu0 %v3872_v0 }
 0xd79   :  { %3518 = vmatpush3.msra.mxu0 %v4159_v60 }
 0xd7a   :  { %3519 = vmatprep.subr.mxu0 %v3872_v0 }
 0xd7b   :  { %3520 = vmatpush3.msra.mxu0 %v4172_v63 }
 0xd7c   :  { %3535 = vmatprep.subr.mxu0 %v3872_v0 }
 0xdcc   :  { %v1951_v5 = vpop.permute.xlu1 %1950 }
 0xdcd   :  { %3489 = vmatmul.mubr.msk.f32.vlgmr.msra.gmra.mxu1 %vm152_vm2, %v1951_v5 }
 0xdce   :  { %3503 = vmatpush3.msra.mxu1 %v4058_v18  ;;  %3510 = vmatprep.mubr.msk.f32.mxu1 %vm3873_vm0, %v3872_v0 }
 0xdcf   :  { %3504 = vmatprep.subr.mxu1 %v3872_v0 }
 0xdd0   :  { %3505 = vmatpush3.msra.mxu1 %v4063_v19 }
 0xdd1   :  { %3506 = vmatprep.subr.mxu1 %v3872_v0 }
 0xdd2   :  { %3507 = vmatpush3.msra.mxu1 %v4069_v20 }
 0xdd3   :  { %3508 = vmatprep.subr.mxu1 %v3872_v0 }
 0xdd4   :  { %3509 = vmatpush3.msra.mxu1 %v4073_v21 }
 0xdd5   :  { %3511 = vmatmul.mubr.msk.f32.vlgmr.msra.gmra.mxu1 %vm152_vm2, %v1951_v5  ;;  %3524 = vmatprep.subr.mxu1 %v3872_v0 }
 0xdd6   :  { %3525 = vmatpush3.msra.mxu1 %v4105_v45  ;;  %3532 = vmatprep.mubr.msk.f32.mxu1 %vm3873_vm0, %v3872_v0 }
 0xdd7   :  { %3526 = vmatprep.subr.mxu1 %v3872_v0 }
 0xdd8   :  { %3527 = vmatpush3.msra.mxu1 %v4107_v46 }
 0xdd9   :  { %3528 = vmatprep.subr.mxu1 %v3872_v0 }
 0xdda   :  { %3529 = vmatpush3.msra.mxu1 %v4112_v48 }
 0xddb   :  { %3530 = vmatprep.subr.mxu1 %v3872_v0 }
 0xddc   :  { %3531 = vmatpush3.msra.mxu1 %v4119_v50 }
 0xddd   :  { %3546 = vmatprep.subr.mxu1 %v3872_v0 }
 0xe34   :  { %v2095_v18 = vpop.f32.mrf.mxu0 }
 0xe35   :  { %v2096_v19 = vadd.f32 %v4203_v9, %v2095_v18  ;;  %v4525_v18 = vld [vmem:[%s4622_s4] ss:$0 sm:$0xff] }
 0xe36   :  { %v3501_v20 = vpop.f32.mrf.mxu0 }
 0xe37   :  { %2107 = vrot.lane.b32.xlu0 %v2096_v19, %s3874_s18 }
 0xe8d   :  { %v2020_v21 = vpop.f32.mrf.mxu1 }
 0xe8e   :  { %v2021_v45 = vadd.f32 %v4235_v25, %v2020_v21 }
 0xe8f   :  { %v3490_v46 = vpop.f32.mrf.mxu1 }
 0xe90   :  { %v2099_v22 = vadd.f32 %v2096_v19, %v2021_v45 }
 0xe92   :  { %v3066_v8 = vmul.f32 -1.442695, %v2099_v22  ;;  %v4533_v22 = vld [vmem:[%s4621_s3] ss:$0 sm:$0xff] }
 0xe94   :  { %3678 = vpow2.f32 %v3066_v8  ;;  %v671_v8 = vadd.f32 %v4533_v22, %v4086_v28 }
 0xe95   :  { %v2191_v48 = vpop.f32.mrf.mxu1 }
 0xe96   :  { %v2192_v6 = vadd.f32 %v4091_v30, %v2191_v48 }
 0xe97   :  { %v3512_v14 = vpop.f32.mrf.mxu1 }
 0xe98   :  { %2203 = vrot.lane.b32.xlu1 %v2192_v6, %s3874_s18  ;;  %v2195_v33 = vadd.f32 %v2192_v6, %v596_v32 }
 0xe9a   :  { %v3068_v35 = vmul.f32 -1.442695, %v2195_v33 }
 0xea1   :  { %v3679_v50 = vpop.eup %3678 }
 0xea2   :  { %v2103_v23 = vadd.f32 1.0, %v3679_v50 }
 0xea4   :  { %3680 = vrcp.f32 %v2103_v23 }
 0xea5   :  { %3682 = vpow2.f32 %v3068_v35 }
 0xea9   :  { %v2108_v29 = vpop.permute.xlu0 %2107 }
 0xeb1   :  { %v3681_v27 = vpop.eup %3680 }
 0xeb2   :  { %v2110_v31 = vmul.f32 %v3681_v27, %v2108_v29  ;;  %v3683_v36 = vpop.eup %3682  ;;  %v2117_v15 = vsub.f32 1.0, %v3681_v27  ;;  %v2123_v49 = vmul.f32 %v3681_v27, %v4407_v3 }
 0xeb3   :  { %v2199_v37 = vadd.f32 1.0, %v3683_v36 }
 0xeb4   :  { %2112 = vrot.lane.b32.xlu0 %v2110_v31, %s3874_s18 }
 0xeb5   :  { %3684 = vrcp.f32 %v2199_v37 }
 0xec2   :  { %v3685_v30 = vpop.eup %3684 }
 0xec3   :  { %v2213_v53 = vsub.f32 1.0, %v3685_v30  ;;  %v2219_v55 = vmul.f32 %v3685_v30, %v4412_v16 }
 0xf0a   :  { %v2204_v38 = vpop.permute.xlu1 %2203 }
 0xf0b   :  { %v2206_v39 = vmul.f32 %v3685_v30, %v2204_v38 }
 0xf0d   :  { %2208 = vrot.lane.b32.xlu1 %v2206_v39, %s3874_s18 }
 0xf26   :  { %v2113_v40 = vpop.permute.xlu0 %2112 }
 0xf27   :  { %v2115_v41 = vadd.f32 %v2113_v40, %v2021_v45 }
 0xf29   :  { %3686 = vtanh.f32 %v2115_v41 }
 0xf36   :  { %v3687_v42 = vpop.eup %3686 }
 0xf37   :  { %2119 = vrot.lane.b32.xlu0 %v3687_v42, %s3875_s21 }
 0xf7f   :  { %v2209_v43 = vpop.permute.xlu1 %2208 }
 0xf80   :  { %v2211_v44 = vadd.f32 %v2209_v43, %v596_v32 }
 0xf82   :  { %3688 = vtanh.f32 %v2211_v44 }
 0xf8f   :  { %v3689_v34 = vpop.eup %3688 }
 0xf90   :  { %2215 = vrot.lane.b32.xlu1 %v3689_v34, %s3875_s21 }
 0xfa9   :  { %v2120_v47 = vpop.permute.xlu0 %2119 }
 0xfaa   :  { %v2122_v51 = vmul.f32 %v2120_v47, %v2117_v15  ;;  %v3730_v47 = vld [vmem:[#allocation4 + $0x18] sm:$0xff] }
 0xfac   :  { %v4461_v52 = vadd.f32 %v2123_v49, %v2122_v51  ;;  %v3731_v49 = vld [vmem:[#allocation4 + $0x10] sm:$0xff]  ;;  %v3732_v51 = vld [vmem:[#allocation4 + $0x8] sm:$0xff] }
 0xfae   :  { %2297 = vrot.lane.b32.xlu0 %v4461_v52, %s3875_s21 }
0x1002   :  { %v2216_v54 = vpop.permute.xlu1 %2215 }
0x1003   :  { %v2218_v56 = vmul.f32 %v2216_v54, %v2213_v53 }
0x1005   :  { %v4466_v59 = vadd.f32 %v2219_v55, %v2218_v56  ;;  %v3734_v55 = vld [vmem:[#allocation9] ss:$0 sm:$0xff] }
0x1007   :  { %2222 = vrot.lane.b32.xlu1 %v4466_v59, %s3875_s21 }
0x1020   :  { %v2298_v61 = vpop.permute.xlu0 %2297 }
0x1021   :  { %3533 = vmatmul.mubr.msk.f32.vlgmr.msra.gmra.mxu1 %vm152_vm2, %v2298_v61 }
0x1022   :  { %3547 = vmatpush3.msra.mxu1 %v4146_v57  ;;  %3554 = vmatprep.mubr.msk.f32.mxu1 %vm3873_vm0, %v3872_v0  ;;  %v4482_v57 = vld [vmem:[#allocation2 + $0x18] sm:$0xff] }
0x1023   :  { %3548 = vmatprep.subr.mxu1 %v3872_v0 }
0x1024   :  { %3549 = vmatpush3.msra.mxu1 %v4152_v58  ;;  %v4488_v58 = vld [vmem:[#allocation2 + $0x10] sm:$0xff] }
0x1025   :  { %3550 = vmatprep.subr.mxu1 %v3872_v0 }
0x1026   :  { %3551 = vmatpush3.msra.mxu1 %v4159_v60  ;;  %v4492_v60 = vld [vmem:[#allocation2 + $0x8] sm:$0xff] }
0x1027   :  { %3552 = vmatprep.subr.mxu1 %v3872_v0 }
0x1028   :  { %3553 = vmatpush3.msra.mxu1 %v4172_v63  ;;  %v4496_v63 = vld [vmem:[#allocation2] sm:$0xff] }
0x1029   :  { %3568 = vmatprep.subr.mxu1 %v3872_v0 }
0x1079   :  { %v2223_v62 = vpop.permute.xlu1 %2222 }
0x107a   :  { %3522 = vmatmul.mubr.msk.f32.vlgmr.msra.gmra.mxu0 %vm152_vm2, %v2223_v62 }
0x107b   :  { %3536 = vmatpush3.msra.mxu0 %v4482_v57  ;;  %3543 = vmatprep.mubr.msk.f32.mxu0 %vm3873_vm0, %v3872_v0 }
0x107c   :  { %3537 = vmatprep.subr.mxu0 %v3872_v0 }
0x107d   :  { %3538 = vmatpush3.msra.mxu0 %v4488_v58 }
0x107e   :  { %3539 = vmatprep.subr.mxu0 %v3872_v0 }
0x107f   :  { %3540 = vmatpush3.msra.mxu0 %v4492_v60 }
0x1080   :  { %3541 = vmatprep.subr.mxu0 %v3872_v0 }
0x1081   :  { %3542 = vmatpush3.msra.mxu0 %v4496_v63 }
0x1082   :  { %3544 = vmatmul.mubr.msk.f32.vlgmr.msra.gmra.mxu0 %vm152_vm2, %v2223_v62  ;;  %3557 = vmatprep.subr.mxu0 %v3872_v0  ;;  %v3735_v62 = vld [vmem:[#allocation7] ss:$0 sm:$0xff] }
0x1083   :  { %3558 = vmatpush3.msra.mxu0 %v4501_v26  ;;  %3565 = vmatprep.mubr.msk.f32.mxu0 %vm3873_vm0, %v3872_v0 }
0x1084   :  { %3559 = vmatprep.subr.mxu0 %v3872_v0 }
0x1085   :  { %3560 = vmatpush3.msra.mxu0 %v4507_v1 }
0x1086   :  { %3561 = vmatprep.subr.mxu0 %v3872_v0 }
0x1087   :  { %3562 = vmatpush3.msra.mxu0 %v4511_v13 }
0x1088   :  { %3563 = vmatprep.subr.mxu0 %v3872_v0 }
0x1089   :  { %3564 = vmatpush3.msra.mxu0 %v4515_v24 }
0x108a   :  { %3579 = vmatprep.subr.mxu0 %v3872_v0 }
0x10e1   :  { %v2367_v2 = vpop.f32.mrf.mxu1 }
0x10e2   :  { %v2368_v3 = vadd.f32 %v4203_v9, %v2367_v2 }
0x10e3   :  { %v3534_v4 = vpop.f32.mrf.mxu1 }
0x10e4   :  { %2379 = vrot.lane.b32.xlu0 %v2368_v3, %s3874_s18 }
0x113a   :  { %v2292_v10 = vpop.f32.mrf.mxu0 }
0x113b   :  { %v2293_v11 = vadd.f32 %v4235_v25, %v2292_v10 }
0x113c   :  { %v3523_v12 = vpop.f32.mrf.mxu0 }
0x113d   :  { %v2371_v16 = vadd.f32 %v2368_v3, %v2293_v11 }
0x113f   :  { %v3071_v7 = vmul.f32 -1.442695, %v2371_v16 }
0x1141   :  { %3690 = vpow2.f32 %v3071_v7 }
0x1142   :  { %v2463_v5 = vpop.f32.mrf.mxu0 }
0x1143   :  { %v2464_v19 = vadd.f32 %v4525_v18, %v2463_v5 }
0x1144   :  { %v3545_v20 = vpop.f32.mrf.mxu0 }
0x1145   :  { %2475 = vrot.lane.b32.xlu1 %v2464_v19, %s3874_s18  ;;  %v2467_v48 = vadd.f32 %v2464_v19, %v671_v8 }
0x1147   :  { %v3073_v6 = vmul.f32 -1.442695, %v2467_v48 }
0x114e   :  { %v3691_v9 = vpop.eup %3690 }
0x114f   :  { %v2375_v21 = vadd.f32 1.0, %v3691_v9 }
0x1151   :  { %3692 = vrcp.f32 %v2375_v21 }
0x1152   :  { %3694 = vpow2.f32 %v3073_v6 }
0x1156   :  { %v2380_v25 = vpop.permute.xlu0 %2379 }
0x115e   :  { %v3693_v45 = vpop.eup %3692 }
0x115f   :  { %v2382_v46 = vmul.f32 %v3693_v45, %v2380_v25  ;;  %v3695_v14 = vpop.eup %3694  ;;  %v2389_v37 = vsub.f32 1.0, %v3693_v45  ;;  %v2395_v38 = vmul.f32 %v3693_v45, %v4461_v52  ;;  %v3733_v52 = vld [vmem:[#allocation4] sm:$0xff] }
0x1160   :  { %v2471_v50 = vadd.f32 1.0, %v3695_v14 }
0x1161   :  { %2384 = vrot.lane.b32.xlu0 %v2382_v46, %s3874_s18 }
0x1162   :  { %3696 = vrcp.f32 %v2471_v50 }
0x116f   :  { %v3697_v23 = vpop.eup %3696 }
0x1170   :  { %v2485_v41 = vsub.f32 1.0, %v3697_v23  ;;  %v2491_v43 = vmul.f32 %v3697_v23, %v4466_v59 }
0x11b7   :  { %v2476_v27 = vpop.permute.xlu1 %2475 }
0x11b8   :  { %v2478_v29 = vmul.f32 %v3697_v23, %v2476_v27 }
0x11ba   :  { %2480 = vrot.lane.b32.xlu1 %v2478_v29, %s3874_s18 }
0x11d3   :  { %v2385_v31 = vpop.permute.xlu0 %2384 }
0x11d4   :  { %v2387_v32 = vadd.f32 %v2385_v31, %v2293_v11  ;;  %v746_v11 = vadd.f32 %v4533_v22, %v4211_v17 }
0x11d6   :  { %3698 = vtanh.f32 %v2387_v32 }
0x11e3   :  { %v3699_v33 = vpop.eup %3698 }
0x11e4   :  { %2391 = vrot.lane.b32.xlu0 %v3699_v33, %s3875_s21 }
0x122c   :  { %v2481_v35 = vpop.permute.xlu1 %2480 }
0x122d   :  { %v2483_v36 = vadd.f32 %v2481_v35, %v671_v8 }
0x122f   :  { %3700 = vtanh.f32 %v2483_v36 }
0x123c   :  { %v3701_v28 = vpop.eup %3700 }
0x123d   :  { %2487 = vrot.lane.b32.xlu1 %v3701_v28, %s3875_s21 }
0x1256   :  { %v2392_v30 = vpop.permute.xlu0 %2391 }
0x1257   :  { %v2394_v39 = vmul.f32 %v2392_v30, %v2389_v37 }
0x1259   :  { %v4541_v40 = vadd.f32 %v2395_v38, %v2394_v39 }
0x125b   :  { %2569 = vrot.lane.b32.xlu0 %v4541_v40, %s3875_s21 }
0x12af   :  { %v2488_v42 = vpop.permute.xlu1 %2487 }
0x12b0   :  { %v2490_v44 = vmul.f32 %v2488_v42, %v2485_v41 }
0x12b2   :  { %v4546_v34 = vadd.f32 %v2491_v43, %v2490_v44 }
0x12b4   :  { %2494 = vrot.lane.b32.xlu1 %v4546_v34, %s3875_s21 }
0x12cd   :  { %v2570_v15 = vpop.permute.xlu0 %2569 }
0x12ce   :  { %3566 = vmatmul.mubr.msk.f32.vlgmr.msra.gmra.mxu0 %vm152_vm2, %v2570_v15 }
0x12cf   :  { %3580 = vmatpush3.msra.mxu0 %v3730_v47  ;;  %3587 = vmatprep.mubr.msk.f32.mxu0 %vm3873_vm0, %v3872_v0 }
0x12d0   :  { %3581 = vmatprep.subr.mxu0 %v3872_v0 }
0x12d1   :  { %3582 = vmatpush3.msra.mxu0 %v3731_v49  ;;  %v139_v49 = vld [vmem:[%s4627_s9 + $0x18] sm:$0xff] }
0x12d2   :  { %3583 = vmatprep.subr.mxu0 %v3872_v0 }
0x12d3   :  { %3584 = vmatpush3.msra.mxu0 %v3732_v51  ;;  %v138_v51 = vld [vmem:[%s4627_s9 + $0x10] sm:$0xff] }
0x12d4   :  { %3585 = vmatprep.subr.mxu0 %v3872_v0 }
0x12d5   :  { %3586 = vmatpush3.msra.mxu0 %v3733_v52  ;;  %v137_v52 = vld [vmem:[%s4627_s9 + $0x8] sm:$0xff] }
0x12d6   :  { %3601 = vmatprep.subr.mxu0 %v3872_v0 }
0x1326   :  { %v2495_v53 = vpop.permute.xlu1 %2494 }
0x1327   :  { %3555 = vmatmul.mubr.msk.f32.vlgmr.msra.gmra.mxu1 %vm152_vm2, %v2495_v53 }
0x1328   :  { %3569 = vmatpush3.msra.mxu1 %v4482_v57  ;;  %3576 = vmatprep.mubr.msk.f32.mxu1 %vm3873_vm0, %v3872_v0 }
0x1329   :  { %3570 = vmatprep.subr.mxu1 %v3872_v0 }
0x132a   :  { %3571 = vmatpush3.msra.mxu1 %v4488_v58 }
0x132b   :  { %3572 = vmatprep.subr.mxu1 %v3872_v0 }
0x132c   :  { %3573 = vmatpush3.msra.mxu1 %v4492_v60 }
0x132d   :  { %3574 = vmatprep.subr.mxu1 %v3872_v0 }
0x132e   :  { %3575 = vmatpush3.msra.mxu1 %v4496_v63 }
0x132f   :  { %3577 = vmatmul.mubr.msk.f32.vlgmr.msra.gmra.mxu1 %vm152_vm2, %v2495_v53  ;;  %3590 = vmatprep.subr.mxu1 %v3872_v0  ;;  %v136_v53 = vld [vmem:[%s4627_s9] sm:$0xff] }
0x1330   :  { %3591 = vmatpush3.msra.mxu1 %v4501_v26  ;;  %3598 = vmatprep.mubr.msk.f32.mxu1 %vm3873_vm0, %v3872_v0 }
0x1331   :  { %3592 = vmatprep.subr.mxu1 %v3872_v0 }
0x1332   :  { %3593 = vmatpush3.msra.mxu1 %v4507_v1 }
0x1333   :  { %3594 = vmatprep.subr.mxu1 %v3872_v0 }
0x1334   :  { %3595 = vmatpush3.msra.mxu1 %v4511_v13 }
0x1335   :  { %3596 = vmatprep.subr.mxu1 %v3872_v0 }
0x1336   :  { %3597 = vmatpush3.msra.mxu1 %v4515_v24 }
0x138e   :  { %v2639_v54 = vpop.f32.mrf.mxu0 }
0x138f   :  { %v2640_v56 = vadd.f32 %v3734_v55, %v2639_v54 }
0x1390   :  { %v3567_v59 = vpop.f32.mrf.mxu0 }
0x1391   :  { %2651 = vrot.lane.b32.xlu0 %v2640_v56, %s3874_s18 }
0x13e7   :  { %v2564_v61 = vpop.f32.mrf.mxu1 }
0x13e8   :  { %v2565_v57 = vadd.f32 %v3735_v62, %v2564_v61 }
0x13e9   :  { %v3556_v58 = vpop.f32.mrf.mxu1 }
0x13ea   :  { %v2643_v60 = vadd.f32 %v2640_v56, %v2565_v57  ;;  %v3082_v58 = vld [vmem:[#allocation10] ss:$0 sm:$0xff] }
0x13ec   :  { %v3076_v63 = vmul.f32 -1.442695, %v2643_v60 }
0x13ee   :  { %3702 = vpow2.f32 %v3076_v63 }
0x13ef   :  { %v2735_v26 = vpop.f32.mrf.mxu1 }
0x13f0   :  { %v2736_v1 = vadd.f32 %v4525_v18, %v2735_v26 }
0x13f1   :  { %v3578_v13 = vpop.f32.mrf.mxu1 }
0x13f2   :  { %2747 = vrot.lane.b32.xlu1 %v2736_v1, %s3874_s18  ;;  %v2739_v12 = vadd.f32 %v2736_v1, %v746_v11 }
0x13f4   :  { %v3078_v16 = vmul.f32 -1.442695, %v2739_v12 }
0x13fb   :  { %v3703_v24 = vpop.eup %3702 }
0x13fc   :  { %v2647_v2 = vadd.f32 1.0, %v3703_v24 }
0x13fe   :  { %3704 = vrcp.f32 %v2647_v2 }
0x13ff   :  { %3706 = vpow2.f32 %v3078_v16 }
0x1403   :  { %v2652_v4 = vpop.permute.xlu0 %2651 }
0x140b   :  { %v3705_v3 = vpop.eup %3704 }
0x140c   :  { %v2654_v10 = vmul.f32 %v3705_v3, %v2652_v4  ;;  %v3707_v7 = vpop.eup %3706  ;;  %v2661_v22 = vsub.f32 1.0, %v3705_v3  ;;  %v2667_v48 = vmul.f32 %v3705_v3, %v4541_v40 }
0x140d   :  { %v2743_v5 = vadd.f32 1.0, %v3707_v7 }
0x140e   :  { %2656 = vrot.lane.b32.xlu0 %v2654_v10, %s3874_s18 }
0x140f   :  { %3708 = vrcp.f32 %v2743_v5 }
0x141c   :  { %v3709_v18 = vpop.eup %3708 }
0x141d   :  { %v2757_v50 = vsub.f32 1.0, %v3709_v18  ;;  %v2763_v27 = vmul.f32 %v3709_v18, %v4546_v34 }
0x1464   :  { %v2748_v19 = vpop.permute.xlu1 %2747 }
0x1465   :  { %v2750_v20 = vmul.f32 %v3709_v18, %v2748_v19 }
0x1467   :  { %2752 = vrot.lane.b32.xlu1 %v2750_v20, %s3874_s18 }
0x1480   :  { %v2657_v9 = vpop.permute.xlu0 %2656 }
0x1481   :  { %v2659_v21 = vadd.f32 %v2657_v9, %v2565_v57 }
0x1483   :  { %3710 = vtanh.f32 %v2659_v21 }
0x1490   :  { %v3711_v45 = vpop.eup %3710 }
0x1491   :  { %2663 = vrot.lane.b32.xlu0 %v3711_v45, %s3875_s21 }
0x14d9   :  { %v2753_v25 = vpop.permute.xlu1 %2752 }
0x14da   :  { %v2755_v46 = vadd.f32 %v2753_v25, %v746_v11 }
0x14dc   :  { %3712 = vtanh.f32 %v2755_v46 }
0x14e9   :  { %v3713_v17 = vpop.eup %3712 }
0x14ea   :  { %2759 = vrot.lane.b32.xlu1 %v3713_v17, %s3875_s21 }
0x1503   :  { %v2664_v8 = vpop.permute.xlu0 %2663 }
0x1504   :  { %v2666_v6 = vmul.f32 %v2664_v8, %v2661_v22 }
0x1506   :  { %v2668_v14 = vadd.f32 %v2667_v48, %v2666_v6 }
0x1508   :  { %2841 = vrot.lane.b32.xlu0 %v2668_v14, %s3875_s21 }
0x155c   :  { %v2760_v23 = vpop.permute.xlu1 %2759 }
0x155d   :  { %v2762_v29 = vmul.f32 %v2760_v23, %v2757_v50 }
0x155f   :  { %v2764_v31 = vadd.f32 %v2763_v27, %v2762_v29 }
0x1561   :  { %2766 = vrot.lane.b32.xlu1 %v2764_v31, %s3875_s21 }
0x157a   :  { %v2842_v32 = vpop.permute.xlu0 %2841 }
0x157b   :  { %3599 = vmatmul.mubr.msk.f32.vlgmr.msra.gmra.mxu1 %vm152_vm2, %v2842_v32 }
0x15d3   :  { %v2767_v33 = vpop.permute.xlu1 %2766 }
0x15d4   :  { %3588 = vmatmul.mubr.msk.f32.vlgmr.msra.gmra.mxu0 %vm152_vm2, %v2767_v33 }
0x15d5   :  { %3609 = vmatprep.mubr.msk.f32.mxu0 %vm3873_vm0, %v3872_v0  ;;  %3602 = vmatpush3.msra.mxu0 %v139_v49 }
0x15d6   :  { %3603 = vmatprep.subr.mxu0 %v3872_v0 }
0x15d7   :  { %3604 = vmatpush3.msra.mxu0 %v138_v51 }
0x15d8   :  { %3605 = vmatprep.subr.mxu0 %v3872_v0 }
0x15d9   :  { %3606 = vmatpush3.msra.mxu0 %v137_v52 }
0x15da   :  { %3607 = vmatprep.subr.mxu0 %v3872_v0 }
0x15db   :  { %3608 = vmatpush3.msra.mxu0 %v136_v53 }
0x163b   :  { %v2911_v35 = vpop.f32.mrf.mxu1 }
0x163c   :  { %v2912_v36 = vadd.f32 %v3734_v55, %v2911_v35 }
0x163d   :  { %v3600_v28 = vpop.f32.mrf.mxu1 }
0x163e   :  { %2923 = vrot.lane.b32.xlu0 %v2912_v36, %s3874_s18 }
0x1694   :  { %v2836_v37 = vpop.f32.mrf.mxu0 }
0x1695   :  { %v2837_v30 = vadd.f32 %v3735_v62, %v2836_v37 }
0x1696   :  { %v3589_v38 = vpop.f32.mrf.mxu0 }
0x1697   :  { %v2915_v39 = vadd.f32 %v2912_v36, %v2837_v30 }
0x1699   :  { %v3081_v40 = vmul.f32 -1.442695, %v2915_v39 }
0x169b   :  { %3714 = vpow2.f32 %v3081_v40 }
0x16a8   :  { %v3715_v41 = vpop.eup %3714 }
0x16a9   :  { %v2919_v42 = vadd.f32 1.0, %v3715_v41 }
0x16ab   :  { %3716 = vrcp.f32 %v2919_v42 }
0x16b0   :  { %v2924_v44 = vpop.permute.xlu0 %2923 }
0x16b8   :  { %v3717_v43 = vpop.eup %3716 }
0x16b9   :  { %v2926_v34 = vmul.f32 %v3717_v43, %v2924_v44  ;;  %v2933_v55 = vsub.f32 1.0, %v3717_v43  ;;  %v2939_v59 = vmul.f32 %v3717_v43, %v2668_v14 }
0x16bb   :  { %2928 = vrot.lane.b32.xlu1 %v2926_v34, %s3874_s18 }
0x172d   :  { %v2929_v15 = vpop.permute.xlu1 %2928 }
0x172e   :  { %v2931_v47 = vadd.f32 %v2929_v15, %v2837_v30 }
0x1730   :  { %3718 = vtanh.f32 %v2931_v47 }
0x173d   :  { %v3719_v54 = vpop.eup %3718 }
0x173e   :  { %2935 = vrot.lane.b32.xlu0 %v3719_v54, %s3875_s21 }
0x17b0   :  { %v2936_v56 = vpop.permute.xlu0 %2935 }
0x17b1   :  { %v2938_v61 = vmul.f32 %v2936_v56, %v2933_v55 }
0x17b3   :  { %v2940_v62 = vadd.f32 %v2939_v59, %v2938_v61 }
0x17b5   :  { %2948 = vrot.lane.b32.xlu1 %v2940_v62, %s3875_s21 }
0x1827   :  { %v2949_v57 = vpop.permute.xlu1 %2948 }
0x1828   :  { %3610 = vmatmul.mubr.msk.f32.vlgmr.msra.gmra.mxu0 %vm152_vm2, %v2949_v57 }
0x18e8   :  { %v3018_v60 = vpop.f32.mrf.mxu0 }
0x18e9   :  { %v3019_v63 = vadd.f32 %v3082_v58, %v3018_v60 }
0x18ea   :  { %v3611_v26 = vpop.f32.mrf.mxu0 }
0x18eb   :  { %3023 = vst.msk [vmem:[%s4629_s11] sm:$0x3] %vm3022_vm3, %v3019_v63 }
0x18ec   :  { %3028 = vsyncpa [#allocation3], 1 }
0x18ed   :  { %3029 = vsyncpa [#allocation5], 1 }
0x18ee   :  { %3030 = vsyncpa [#allocation8], 1 }
0x18ef   :  { %3031 = vsyncpa [#allocation11], 1 }

</bundles_post_ra>
